<compile_context>
chip_gen: v5e
topology: v5e:2x2
jax: 0.10.0
libtpu: 0.0.40
codegen_flags: <defaults>
</compile_context>

<pallas_src>
import jax
import jax.numpy as jnp
from jax import lax
from jax.experimental import pallas as pl
from jax.experimental.pallas import tpu as pltpu


def _round_up(x, m):
    return (x + m - 1) // m * m


def _pick_lane_tile(m, bytes_per_lane, *, cap, vmem_budget=9 << 20):
    """Lane tile (multiple of 128): as large as a conservative double-buffered
    VMEM budget allows (fits v5e/v6e/v7x scoped defaults without a limit bump),
    <= cap, and <= ~M/2 so the 'parallel' grid keeps >= 2 steps (v7x megacore)."""
    m128 = _round_up(m, 128)
    t = min(cap, m128)
    by_vmem = max(128, (vmem_budget // (2 * bytes_per_lane)) // 128 * 128)
    t = min(t, by_vmem)
    if m128 >= 256:
        t = min(t, _round_up(m128 // 2, 128))
    return max(t, 128)


# ---------------------------------------------------------------------------
# Kernel 1: fused conv (single GEMM over interleaved im2col) + bias + ReLU + 2x2 maxpool
# ---------------------------------------------------------------------------
def _conv_relu_pool_kernel(p_ref, w_ref, b_ref, o_ref):
    # p_ref: (K2, 4*Mt) bf16 -- the 4 pool-window positions lane-interleaved per tile
    # w_ref: (Cout, K2) bf16, b_ref: (Cout, 1) f32, o_ref: (Cout, Mt)
    mt = o_ref.shape[-1]
    acc = jnp.dot(w_ref[...], p_ref[...], preferred_element_type=jnp.float32)
    acc = jnp.maximum(acc + b_ref[...], 0.0)          # bias + ReLU in f32 (PyTorch order)
    # 2x2 maxpool = three pairwise maxima over 128-aligned lane slices (pure VPU).
    o = jnp.maximum(jnp.maximum(acc[:, 0 * mt:1 * mt], acc[:, 1 * mt:2 * mt]),
                    jnp.maximum(acc[:, 2 * mt:3 * mt], acc[:, 3 * mt:4 * mt]))
    o_ref[...] = o.astype(o_ref.dtype)


def conv_relu_pool(x_chwb, w, b, *, m_tile_cap=8192, out_dtype=jnp.bfloat16):
    """Fused valid conv (stride 1) + bias + ReLU + 2x2 maxpool.

    x_chwb: (Cin, H, W, B) channel/spatial-major, batch-minor.
    w: (Cout, Cin, K, K) (PyTorch layout, used as-is); b: (Cout,).
    Returns (Cout, Hp, Wp, B) with Hp = (H-K+1)//2, Wp = (W-K+1)//2.
    """
    Cin, H, W, B = x_chwb.shape
    Cout, Cin2, K, _ = w.shape
    assert Cin == Cin2
    Ho, Wo = H - K + 1, W - K + 1
    assert Ho % 2 == 0 and Wo % 2 == 0, "2x2 maxpool assumes even conv output"
    Hp, Wp = Ho // 2, Wo // 2
    K2 = Cin * K * K
    M = Hp * Wp * B

    x_bf = x_chwb.astype(jnp.bfloat16)

    # Input block is (K2, 4*Mt) bf16 -> 8*K2 bytes per lane of Mt.
    Mt = _pick_lane_tile(M, 8 * K2, cap=m_tile_cap)
    Mpad = _round_up(M, Mt)
    nT = Mpad // Mt

    # im2col, built with strided slices (no 7-D transpose) directly in the layout
    # the kernel consumes: (K2, nT*4*Mt) with lanes ordered (tile, pool-window, m),
    # m = (hp, wp, b) spatial-major / batch-minor.
    def window_patches(ph, pw):
        # rows ordered (ci, kh, kw) to match w.reshape(Cout, Cin*K*K)
        slices = [x_bf[:, ph + kh: ph + kh + 2 * Hp - 1: 2,
                        pw + kw: pw + kw + 2 * Wp - 1: 2, :]
                  for kh in range(K) for kw in range(K)]
        p = jnp.stack(slices, axis=1).reshape(K2, M)
        if Mpad != M:
            p = jnp.pad(p, ((0, 0), (0, Mpad - M)))
        return p.reshape(K2, nT, Mt)

    patches = jnp.stack([window_patches(ph, pw)
                         for ph in range(2) for pw in range(2)],
                        axis=2).reshape(K2, nT * 4 * Mt)

    wmat = w.reshape(Cout, K2).astype(jnp.bfloat16)       # PyTorch weight as-is
    bcol = b.reshape(Cout, 1).astype(jnp.float32)

    cost = pl.CostEstimate(
        flops=2 * Cout * K2 * 4 * Mpad,
        transcendentals=0,
        bytes_accessed=int(patches.size * 2 + wmat.size * 2 + bcol.size * 4
                           + Cout * Mpad * jnp.dtype(out_dtype).itemsize))

    out = pl.pallas_call(
        _conv_relu_pool_kernel,
        out_shape=jax.ShapeDtypeStruct((Cout, Mpad), out_dtype),
        grid=(nT,),
        in_specs=[
            pl.BlockSpec((K2, 4 * Mt), lambda i: (0, i)),
            pl.BlockSpec((Cout, K2), lambda i: (0, 0)),
            pl.BlockSpec((Cout, 1), lambda i: (0, 0)),
        ],
        out_specs=pl.BlockSpec((Cout, Mt), lambda i: (0, i)),
        compiler_params=pltpu.CompilerParams(
            dimension_semantics=("parallel",)),
        cost_estimate=cost,
    )(patches, wmat, bcol)

    return out[:, :M].reshape(Cout, Hp, Wp, B)


# ---------------------------------------------------------------------------
# Kernel 2: fused fc1 + ReLU + fc2 + ReLU + fc3 (weights VMEM-resident, bf16 MXU)
# ---------------------------------------------------------------------------
def _fc_stack_kernel(x_ref, w1_ref, b1_ref, w2_ref, b2_ref, w3_ref, b3_ref, o_ref):
    h = jnp.dot(w1_ref[...], x_ref[...], preferred_element_type=jnp.float32)
    h = jnp.maximum(h + b1_ref[...], 0.0).astype(jnp.bfloat16)
    h = jnp.dot(w2_ref[...], h, preferred_element_type=jnp.float32)
    h = jnp.maximum(h + b2_ref[...], 0.0).astype(jnp.bfloat16)
    o = jnp.dot(w3_ref[...], h, preferred_element_type=jnp.float32)
    o_ref[...] = (o + b3_ref[...]).astype(o_ref.dtype)


def fc_stack(feat, w1, b1, w2, b2, w3, b3, *, b_tile_cap=2048):
    """feat: (F, B) feature-major (batch lane-dense). Returns (n_out, B) f32."""
    F, B = feat.shape
    feat = feat.astype(jnp.bfloat16)
    Bt = _pick_lane_tile(B, 2 * F, cap=b_tile_cap)
    Bpad = _round_up(B, Bt)
    if Bpad != B:
        feat = jnp.pad(feat, ((0, 0), (0, Bpad - B)))

    n1, n2, n3 = w1.shape[0], w2.shape[0], w3.shape[0]
    w1b, w2b, w3b = (w.astype(jnp.bfloat16) for w in (w1, w2, w3))
    wsize = n1 * F + n2 * n1 + n3 * n2
    cost = pl.CostEstimate(
        flops=2 * wsize * Bpad,
        transcendentals=0,
        bytes_accessed=int(F * Bpad * 2 + wsize * 2 + (n1 + n2 + n3) * 4
                           + n3 * Bpad * 4))

    out = pl.pallas_call(
        _fc_stack_kernel,
        out_shape=jax.ShapeDtypeStruct((n3, Bpad), jnp.float32),
        grid=(Bpad // Bt,),
        in_specs=[
            pl.BlockSpec((F, Bt), lambda i: (0, i)),
            pl.BlockSpec((n1, F), lambda i: (0, 0)),
            pl.BlockSpec((n1, 1), lambda i: (0, 0)),
            pl.BlockSpec((n2, n1), lambda i: (0, 0)),
            pl.BlockSpec((n2, 1), lambda i: (0, 0)),
            pl.BlockSpec((n3, n2), lambda i: (0, 0)),
            pl.BlockSpec((n3, 1), lambda i: (0, 0)),
        ],
        out_specs=pl.BlockSpec((n3, Bt), lambda i: (0, i)),
        compiler_params=pltpu.CompilerParams(
            dimension_semantics=("parallel",)),
        cost_estimate=cost,
    )(feat,
      w1b, b1.reshape(n1, 1).astype(jnp.float32),
      w2b, b2.reshape(n2, 1).astype(jnp.float32),
      w3b, b3.reshape(n3, 1).astype(jnp.float32))
    return out[:, :B]


# ---------------------------------------------------------------------------
# LeNet forward
# ---------------------------------------------------------------------------
def init_params(key):
    ks = jax.random.split(key, 10)

    def t(k, shape, scale=0.1):
        return (scale * jax.random.normal(k, shape)).astype(jnp.float32)

    return {
        "conv1_w": t(ks[0], (6, 1, 5, 5)),
        "conv1_b": t(ks[1], (6,)),
        "conv2_w": t(ks[2], (16, 6, 5, 5)),
        "conv2_b": t(ks[3], (16,)),
        "fc1_w": t(ks[4], (120, 16 * 4 * 4)),
        "fc1_b": t(ks[5], (120,)),
        "fc2_w": t(ks[6], (84, 120)),
        "fc2_b": t(ks[7], (84,)),
        "fc3_w": t(ks[8], (10, 84)),
        "fc3_b": t(ks[9], (10,)),
    }


@jax.jit
def lenet_forward(params, x):
    B = x.shape[0]
    # Single entry transpose to channel/spatial-major, batch-minor layout; all
    # later stages chain with zero HBM transposes (flatten is a free reshape).
    x = jnp.transpose(x, (1, 2, 3, 0))                              # (1, 28, 28, B)
    x = conv_relu_pool(x, params["conv1_w"], params["conv1_b"])     # (6, 12, 12, B) bf16
    x = conv_relu_pool(x, params["conv2_w"], params["conv2_b"])     # (16, 4, 4, B) bf16
    # PyTorch .view(-1, 16*4*4) flattens per-sample in (c, h, w) order:
    # (16, 4, 4, B) -> (256, B) is exactly that, as a free row-major reshape.
    feat = x.reshape(16 * 4 * 4, B)
    # nn.Dropout(p=0.2) is identity at inference (eval mode); not applied.
    out = fc_stack(feat,
                   params["fc1_w"], params["fc1_b"],
                   params["fc2_w"], params["fc2_b"],
                   params["fc3_w"], params["fc3_b"])                # (10, B)
    return out.T                                                    # (B, 10)


# Pure-JAX f32 reference (sanity check only)
def lenet_reference(params, x):
    dn = lax.conv_dimension_numbers(x.shape, params["conv1_w"].shape,
                                    ("NCHW", "OIHW", "NCHW"))
    x = lax.conv_general_dilated(x, params["conv1_w"], (1, 1), "VALID",
                                 dimension_numbers=dn)
    x = jax.nn.relu(x + params["conv1_b"][None, :, None, None])
    x = lax.reduce_window(x, -jnp.inf, lax.max, (1, 1, 2, 2), (1, 1, 2, 2), "VALID")
    dn = lax.conv_dimension_numbers(x.shape, params["conv2_w"].shape,
                                    ("NCHW", "OIHW", "NCHW"))
    x = lax.conv_general_dilated(x, params["conv2_w"], (1, 1), "VALID",
                                 dimension_numbers=dn)
    x = jax.nn.relu(x + params["conv2_b"][None, :, None, None])
    x = lax.reduce_window(x, -jnp.inf, lax.max, (1, 1, 2, 2), (1, 1, 2, 2), "VALID")
    x = x.reshape(x.shape[0], 16 * 4 * 4)
    x = jax.nn.relu(x @ params["fc1_w"].T + params["fc1_b"])
    x = jax.nn.relu(x @ params["fc2_w"].T + params["fc2_b"])
    return x @ params["fc3_w"].T + params["fc3_b"]


if __name__ == "__main__":
    key = jax.random.PRNGKey(0)
    pkey, xkey = jax.random.split(key)
    params = init_params(pkey)
    # LeNet expects 1x28x28 inputs (MNIST): the 16*4*4 flatten only holds at 28x28.
    x = jax.random.normal(xkey, (2, 1, 28, 28), dtype=jnp.float32)

    out = lenet_forward(params, x)
    out = jax.block_until_ready(out)
    assert out.shape == (2, 10), out.shape

    ref = lenet_reference(params, x)
    # Tolerance reflects bf16-streamed operands with f32 accumulation.
    assert jnp.allclose(out, ref, atol=2e-2, rtol=2e-2), (
        float(jnp.max(jnp.abs(out - ref))))

    print("KERNEL_OK")
</pallas_src>

<mosaic_0001>
module attributes {stable_mosaic.version = 11 : i64} {
  func.func @_conv_relu_pool_kernel(%arg0: i32, %arg1: memref<25x1024xbf16, #tpu.memory_space<vmem>>, %arg2: memref<6x25xbf16, #tpu.memory_space<vmem>>, %arg3: memref<6x1xf32, #tpu.memory_space<vmem>>, %arg4: memref<6x256xbf16, #tpu.memory_space<vmem>>) attributes {dimension_semantics = [#tpu.dimension_semantics<parallel>], iteration_bounds = array<i64: 2>, scalar_prefetch = 0 : i64, scratch_operands = 0 : i64, tpu.core_type = #tpu.core_type<tc>, window_params = [{transform_indices = @transform_0, window_bounds = array<i64: 25, 1024>}, {pipeline_mode = #tpu.pipeline_mode<synchronous>, transform_indices = @transform_1, window_bounds = array<i64: 6, 25>}, {pipeline_mode = #tpu.pipeline_mode<synchronous>, transform_indices = @transform_2, window_bounds = array<i64: 6, 1>}, {transform_indices = @transform_3, window_bounds = array<i64: 6, 256>}]} {
    %c0 = arith.constant 0 : index
    %c0_0 = arith.constant 0 : index
    %0 = vector.load %arg2[%c0, %c0_0] : memref<6x25xbf16, #tpu.memory_space<vmem>>, vector<6x25xbf16>
    %c0_1 = arith.constant 0 : index
    %c0_2 = arith.constant 0 : index
    %1 = vector.load %arg1[%c0_1, %c0_2] : memref<25x1024xbf16, #tpu.memory_space<vmem>>, vector<25x1024xbf16>
    %cst = arith.constant dense<0.000000e+00> : vector<6x1024xf32>
    %2 = tpu.matmul %0, %1, %cst {dimension_numbers = #tpu.dot_dimension_numbers<[1], [0], [0], [1], [0, 0, 1, 1], [], []>} : vector<6x25xbf16>, vector<25x1024xbf16>, vector<6x1024xf32> -> vector<6x1024xf32>
    %c0_3 = arith.constant 0 : index
    %c0_4 = arith.constant 0 : index
    %3 = vector.load %arg3[%c0_3, %c0_4] : memref<6x1xf32, #tpu.memory_space<vmem>>, vector<6x1xf32>
    %4 = vector.broadcast %3 : vector<6x1xf32> to vector<6x1024xf32>
    %5 = arith.addf %2, %4 : vector<6x1024xf32>
    %cst_5 = arith.constant 0.000000e+00 : f32
    %6 = vector.broadcast %cst_5 : f32 to vector<6x1024xf32>
    %7 = arith.maximumf %5, %6 : vector<6x1024xf32>
    %8 = vector.extract_strided_slice %7 {offsets = [0, 0], sizes = [6, 256], strides = [1, 1]} : vector<6x1024xf32> to vector<6x256xf32>
    %9 = vector.extract_strided_slice %7 {offsets = [0, 256], sizes = [6, 256], strides = [1, 1]} : vector<6x1024xf32> to vector<6x256xf32>
    %10 = arith.maximumf %8, %9 : vector<6x256xf32>
    %11 = vector.extract_strided_slice %7 {offsets = [0, 512], sizes = [6, 256], strides = [1, 1]} : vector<6x1024xf32> to vector<6x256xf32>
    %12 = vector.extract_strided_slice %7 {offsets = [0, 768], sizes = [6, 256], strides = [1, 1]} : vector<6x1024xf32> to vector<6x256xf32>
    %13 = arith.maximumf %11, %12 : vector<6x256xf32>
    %14 = arith.maximumf %10, %13 : vector<6x256xf32>
    %15 = arith.truncf %14 : vector<6x256xf32> to vector<6x256xbf16>
    %c0_6 = arith.constant 0 : index
    %c0_7 = arith.constant 0 : index
    %16 = vector.load %arg4[%c0_6, %c0_7] : memref<6x256xbf16, #tpu.memory_space<vmem>>, vector<6x256xbf16>
    tpu.vector_store %arg4[%c0_6, %c0_7], %15 {strides = array<i32>} : memref<6x256xbf16, #tpu.memory_space<vmem>>, vector<6x256xbf16>,
    return
  }
  func.func @transform_0(%arg0: i32) -> (i32, i32) {
    %c0_i32 = arith.constant 0 : i32
    %c0_i32_0 = arith.constant 0 : i32
    return %c0_i32, %arg0 : i32, i32
  }
  func.func @transform_1(%arg0: i32) -> (i32, i32) {
    %c0_i32 = arith.constant 0 : i32
    %c0_i32_0 = arith.constant 0 : i32
    %c0_i32_1 = arith.constant 0 : i32
    return %c0_i32, %c0_i32_0 : i32, i32
  }
  func.func @transform_2(%arg0: i32) -> (i32, i32) {
    %c0_i32 = arith.constant 0 : i32
    %c0_i32_0 = arith.constant 0 : i32
    %c0_i32_1 = arith.constant 0 : i32
    return %c0_i32, %c0_i32_0 : i32, i32
  }
  func.func @transform_3(%arg0: i32) -> (i32, i32) {
    %c0_i32 = arith.constant 0 : i32
    %c0_i32_0 = arith.constant 0 : i32
    return %c0_i32, %arg0 : i32, i32
  }
}

module attributes {stable_mosaic.version = 11 : i64} {
  func.func @_conv_relu_pool_kernel(%arg0: i32, %arg1: memref<150x512xbf16, #tpu.memory_space<vmem>>, %arg2: memref<16x150xbf16, #tpu.memory_space<vmem>>, %arg3: memref<16x1xf32, #tpu.memory_space<vmem>>, %arg4: memref<16x128xbf16, #tpu.memory_space<vmem>>) attributes {dimension_semantics = [#tpu.dimension_semantics<parallel>], iteration_bounds = array<i64: 1>, scalar_prefetch = 0 : i64, scratch_operands = 0 : i64, tpu.core_type = #tpu.core_type<tc>, window_params = [{transform_indices = @transform_0, window_bounds = array<i64: 150, 512>}, {pipeline_mode = #tpu.pipeline_mode<synchronous>, transform_indices = @transform_1, window_bounds = array<i64: 16, 150>}, {pipeline_mode = #tpu.pipeline_mode<synchronous>, transform_indices = @transform_2, window_bounds = array<i64: 16, 1>}, {transform_indices = @transform_3, window_bounds = array<i64: 16, 128>}]} {
    %c0 = arith.constant 0 : index
    %c0_0 = arith.constant 0 : index
    %0 = vector.load %arg2[%c0, %c0_0] : memref<16x150xbf16, #tpu.memory_space<vmem>>, vector<16x150xbf16>
    %c0_1 = arith.constant 0 : index
    %c0_2 = arith.constant 0 : index
    %1 = vector.load %arg1[%c0_1, %c0_2] : memref<150x512xbf16, #tpu.memory_space<vmem>>, vector<150x512xbf16>
    %cst = arith.constant dense<0.000000e+00> : vector<16x512xf32>
    %2 = tpu.matmul %0, %1, %cst {dimension_numbers = #tpu.dot_dimension_numbers<[1], [0], [0], [1], [0, 0, 1, 1], [], []>} : vector<16x150xbf16>, vector<150x512xbf16>, vector<16x512xf32> -> vector<16x512xf32>
    %c0_3 = arith.constant 0 : index
    %c0_4 = arith.constant 0 : index
    %3 = vector.load %arg3[%c0_3, %c0_4] : memref<16x1xf32, #tpu.memory_space<vmem>>, vector<16x1xf32>
    %4 = vector.broadcast %3 : vector<16x1xf32> to vector<16x512xf32>
    %5 = arith.addf %2, %4 : vector<16x512xf32>
    %cst_5 = arith.constant 0.000000e+00 : f32
    %6 = vector.broadcast %cst_5 : f32 to vector<16x512xf32>
    %7 = arith.maximumf %5, %6 : vector<16x512xf32>
    %8 = vector.extract_strided_slice %7 {offsets = [0, 0], sizes = [16, 128], strides = [1, 1]} : vector<16x512xf32> to vector<16x128xf32>
    %9 = vector.extract_strided_slice %7 {offsets = [0, 128], sizes = [16, 128], strides = [1, 1]} : vector<16x512xf32> to vector<16x128xf32>
    %10 = arith.maximumf %8, %9 : vector<16x128xf32>
    %11 = vector.extract_strided_slice %7 {offsets = [0, 256], sizes = [16, 128], strides = [1, 1]} : vector<16x512xf32> to vector<16x128xf32>
    %12 = vector.extract_strided_slice %7 {offsets = [0, 384], sizes = [16, 128], strides = [1, 1]} : vector<16x512xf32> to vector<16x128xf32>
    %13 = arith.maximumf %11, %12 : vector<16x128xf32>
    %14 = arith.maximumf %10, %13 : vector<16x128xf32>
    %15 = arith.truncf %14 : vector<16x128xf32> to vector<16x128xbf16>
    %c0_6 = arith.constant 0 : index
    %c0_7 = arith.constant 0 : index
    %16 = vector.load %arg4[%c0_6, %c0_7] : memref<16x128xbf16, #tpu.memory_space<vmem>>, vector<16x128xbf16>
    tpu.vector_store %arg4[%c0_6, %c0_7], %15 {strides = array<i32>} : memref<16x128xbf16, #tpu.memory_space<vmem>>, vector<16x128xbf16>,
    return
  }
  func.func @transform_0(%arg0: i32) -> (i32, i32) {
    %c0_i32 = arith.constant 0 : i32
    %c0_i32_0 = arith.constant 0 : i32
    return %c0_i32, %arg0 : i32, i32
  }
  func.func @transform_1(%arg0: i32) -> (i32, i32) {
    %c0_i32 = arith.constant 0 : i32
    %c0_i32_0 = arith.constant 0 : i32
    %c0_i32_1 = arith.constant 0 : i32
    return %c0_i32, %c0_i32_0 : i32, i32
  }
  func.func @transform_2(%arg0: i32) -> (i32, i32) {
    %c0_i32 = arith.constant 0 : i32
    %c0_i32_0 = arith.constant 0 : i32
    %c0_i32_1 = arith.constant 0 : i32
    return %c0_i32, %c0_i32_0 : i32, i32
  }
  func.func @transform_3(%arg0: i32) -> (i32, i32) {
    %c0_i32 = arith.constant 0 : i32
    %c0_i32_0 = arith.constant 0 : i32
    return %c0_i32, %arg0 : i32, i32
  }
}

module attributes {stable_mosaic.version = 11 : i64} {
  func.func @_fc_stack_kernel(%arg0: i32, %arg1: memref<256x128xbf16, #tpu.memory_space<vmem>>, %arg2: memref<120x256xbf16, #tpu.memory_space<vmem>>, %arg3: memref<120x1xf32, #tpu.memory_space<vmem>>, %arg4: memref<84x120xbf16, #tpu.memory_space<vmem>>, %arg5: memref<84x1xf32, #tpu.memory_space<vmem>>, %arg6: memref<10x84xbf16, #tpu.memory_space<vmem>>, %arg7: memref<10x1xf32, #tpu.memory_space<vmem>>, %arg8: memref<10x128xf32, #tpu.memory_space<vmem>>) attributes {dimension_semantics = [#tpu.dimension_semantics<parallel>], iteration_bounds = array<i64: 1>, scalar_prefetch = 0 : i64, scratch_operands = 0 : i64, tpu.core_type = #tpu.core_type<tc>, window_params = [{transform_indices = @transform_0, window_bounds = array<i64: 256, 128>}, {pipeline_mode = #tpu.pipeline_mode<synchronous>, transform_indices = @transform_1, window_bounds = array<i64: 120, 256>}, {pipeline_mode = #tpu.pipeline_mode<synchronous>, transform_indices = @transform_2, window_bounds = array<i64: 120, 1>}, {pipeline_mode = #tpu.pipeline_mode<synchronous>, transform_indices = @transform_3, window_bounds = array<i64: 84, 120>}, {pipeline_mode = #tpu.pipeline_mode<synchronous>, transform_indices = @transform_4, window_bounds = array<i64: 84, 1>}, {pipeline_mode = #tpu.pipeline_mode<synchronous>, transform_indices = @transform_5, window_bounds = array<i64: 10, 84>}, {pipeline_mode = #tpu.pipeline_mode<synchronous>, transform_indices = @transform_6, window_bounds = array<i64: 10, 1>}, {transform_indices = @transform_7, window_bounds = array<i64: 10, 128>}]} {
    %c0 = arith.constant 0 : index
    %c0_0 = arith.constant 0 : index
    %0 = vector.load %arg2[%c0, %c0_0] : memref<120x256xbf16, #tpu.memory_space<vmem>>, vector<120x256xbf16>
    %c0_1 = arith.constant 0 : index
    %c0_2 = arith.constant 0 : index
    %1 = vector.load %arg1[%c0_1, %c0_2] : memref<256x128xbf16, #tpu.memory_space<vmem>>, vector<256x128xbf16>
    %cst = arith.constant dense<0.000000e+00> : vector<120x128xf32>
    %2 = tpu.matmul %0, %1, %cst {dimension_numbers = #tpu.dot_dimension_numbers<[1], [0], [0], [1], [0, 0, 1, 1], [], []>} : vector<120x256xbf16>, vector<256x128xbf16>, vector<120x128xf32> -> vector<120x128xf32>
    %c0_3 = arith.constant 0 : index
    %c0_4 = arith.constant 0 : index
    %3 = vector.load %arg3[%c0_3, %c0_4] : memref<120x1xf32, #tpu.memory_space<vmem>>, vector<120x1xf32>
    %4 = vector.broadcast %3 : vector<120x1xf32> to vector<120x128xf32>
    %5 = arith.addf %2, %4 : vector<120x128xf32>
    %cst_5 = arith.constant 0.000000e+00 : f32
    %6 = vector.broadcast %cst_5 : f32 to vector<120x128xf32>
    %7 = arith.maximumf %5, %6 : vector<120x128xf32>
    %8 = arith.truncf %7 : vector<120x128xf32> to vector<120x128xbf16>
    %c0_6 = arith.constant 0 : index
    %c0_7 = arith.constant 0 : index
    %9 = vector.load %arg4[%c0_6, %c0_7] : memref<84x120xbf16, #tpu.memory_space<vmem>>, vector<84x120xbf16>
    %cst_8 = arith.constant dense<0.000000e+00> : vector<84x128xf32>
    %10 = tpu.matmul %9, %8, %cst_8 {dimension_numbers = #tpu.dot_dimension_numbers<[1], [0], [0], [1], [0, 0, 1, 1], [], []>} : vector<84x120xbf16>, vector<120x128xbf16>, vector<84x128xf32> -> vector<84x128xf32>
    %c0_9 = arith.constant 0 : index
    %c0_10 = arith.constant 0 : index
    %11 = vector.load %arg5[%c0_9, %c0_10] : memref<84x1xf32, #tpu.memory_space<vmem>>, vector<84x1xf32>
    %12 = vector.broadcast %11 : vector<84x1xf32> to vector<84x128xf32>
    %13 = arith.addf %10, %12 : vector<84x128xf32>
    %cst_11 = arith.constant 0.000000e+00 : f32
    %14 = vector.broadcast %cst_11 : f32 to vector<84x128xf32>
    %15 = arith.maximumf %13, %14 : vector<84x128xf32>
    %16 = arith.truncf %15 : vector<84x128xf32> to vector<84x128xbf16>
    %c0_12 = arith.constant 0 : index
    %c0_13 = arith.constant 0 : index
    %17 = vector.load %arg6[%c0_12, %c0_13] : memref<10x84xbf16, #tpu.memory_space<vmem>>, vector<10x84xbf16>
    %cst_14 = arith.constant dense<0.000000e+00> : vector<10x128xf32>
    %18 = tpu.matmul %17, %16, %cst_14 {dimension_numbers = #tpu.dot_dimension_numbers<[1], [0], [0], [1], [0, 0, 1, 1], [], []>} : vector<10x84xbf16>, vector<84x128xbf16>, vector<10x128xf32> -> vector<10x128xf32>
    %c0_15 = arith.constant 0 : index
    %c0_16 = arith.constant 0 : index
    %19 = vector.load %arg7[%c0_15, %c0_16] : memref<10x1xf32, #tpu.memory_space<vmem>>, vector<10x1xf32>
    %20 = vector.broadcast %19 : vector<10x1xf32> to vector<10x128xf32>
    %21 = arith.addf %18, %20 : vector<10x128xf32>
    %c0_17 = arith.constant 0 : index
    %c0_18 = arith.constant 0 : index
    %22 = vector.load %arg8[%c0_17, %c0_18] : memref<10x128xf32, #tpu.memory_space<vmem>>, vector<10x128xf32>
    tpu.vector_store %arg8[%c0_17, %c0_18], %21 {strides = array<i32>} : memref<10x128xf32, #tpu.memory_space<vmem>>, vector<10x128xf32>,
    return
  }
  func.func @transform_0(%arg0: i32) -> (i32, i32) {
    %c0_i32 = arith.constant 0 : i32
    %c0_i32_0 = arith.constant 0 : i32
    return %c0_i32, %arg0 : i32, i32
  }
  func.func @transform_1(%arg0: i32) -> (i32, i32) {
    %c0_i32 = arith.constant 0 : i32
    %c0_i32_0 = arith.constant 0 : i32
    %c0_i32_1 = arith.constant 0 : i32
    return %c0_i32, %c0_i32_0 : i32, i32
  }
  func.func @transform_2(%arg0: i32) -> (i32, i32) {
    %c0_i32 = arith.constant 0 : i32
    %c0_i32_0 = arith.constant 0 : i32
    %c0_i32_1 = arith.constant 0 : i32
    return %c0_i32, %c0_i32_0 : i32, i32
  }
  func.func @transform_3(%arg0: i32) -> (i32, i32) {
    %c0_i32 = arith.constant 0 : i32
    %c0_i32_0 = arith.constant 0 : i32
    %c0_i32_1 = arith.constant 0 : i32
    return %c0_i32, %c0_i32_0 : i32, i32
  }
  func.func @transform_4(%arg0: i32) -> (i32, i32) {
    %c0_i32 = arith.constant 0 : i32
    %c0_i32_0 = arith.constant 0 : i32
    %c0_i32_1 = arith.constant 0 : i32
    return %c0_i32, %c0_i32_0 : i32, i32
  }
  func.func @transform_5(%arg0: i32) -> (i32, i32) {
    %c0_i32 = arith.constant 0 : i32
    %c0_i32_0 = arith.constant 0 : i32
    %c0_i32_1 = arith.constant 0 : i32
    return %c0_i32, %c0_i32_0 : i32, i32
  }
  func.func @transform_6(%arg0: i32) -> (i32, i32) {
    %c0_i32 = arith.constant 0 : i32
    %c0_i32_0 = arith.constant 0 : i32
    %c0_i32_1 = arith.constant 0 : i32
    return %c0_i32, %c0_i32_0 : i32, i32
  }
  func.func @transform_7(%arg0: i32) -> (i32, i32) {
    %c0_i32 = arith.constant 0 : i32
    %c0_i32_0 = arith.constant 0 : i32
    return %c0_i32, %arg0 : i32, i32
  }
}

</mosaic_0001>

<bundles_post_ra>
// kernel: lenet_forward.3
= control target key start
LH: loop header
LB: loop body
LE: loop exit
PB: predicated region body
PF: predicated region fallthrough
CT: control target
= control target key end

     0   :  { %s708_s12 = smov 0   ;;  %s710_s13 = smov 0   ;;  %s836_s0 = inlined_call_operand.vmem [shape: bf16[25,2048], index: 0, kind: input, shape index: {}]   ;;  %s837_s1 = inlined_call_operand.vmem [shape: bf16[6,25], index: 1, kind: input, shape index: {}]   ;;  %s838_s2 = inlined_call_operand.vmem [shape: f32[6,1], index: 2, kind: input, shape index: {}]   ;;  %s839_s3 = inlined_call_operand.vmem [shape: bf16[6,512], index: 3, kind: output, shape index: {}]  }
   0x1   :  { %s712_s14 = smov 0  }
   0x2 LB: > { %s533_s15 = sadd.s32 4294967295, %s684_s14   ;;  %s725_s16 = sadd.s32 1, %s684_s14   ;;  %s684_s14 = sphi %s712_s14, %s842_s14   ;;  %s680_s13 = sphi %s710_s13, %s841_s13   ;;  %s676_s12 = sphi %s708_s12, %s840_s12  }
   0x3   : > { %s17_s17 = ssub.s32 %s684_s14, %s725_s16  ;;  %s20_s18 = sadd.s32 1, %s680_s13 }
   0x4   : > { %p18_p0 = scmp.eq.s32.totalorder %s17_s17, 0  ;;  %p27_p1 = scmp.ne.s32.totalorder %s680_s13, %s676_s12 }
   0x5   : > { %p28_p2 = scmp.eq.s32.totalorder %s684_s14, 0  ;;  %p536_p4 = scmp.ge.s32.totalorder %s684_s14, 2 }
   0x6   : > { %s734_s19 = scalar_select %p18_p0, %s680_s13, %s20_s18  }
   0x7   : > { %p29_p3 = por %p28_p2, %p27_p1  ;;  %127 = sbr.rel (%p536_p4) target bundleno = 32 (0x20), region = 24 }
   0xc   : > { %130 = sbr.rel (!%p29_p3) target bundleno = 32 (0x20), region = 28  ;;  %s132_s20 = sand.u32 (%p29_p3), 1, %s680_s13  }
   0xd   : > { %s618_s21 = sshll.u32 (%p29_p3), %s684_s14, 5  ;;  %s537_s22 = sshll.u32 (%p29_p3), %s132_s20, 7 }
   0xe   : > { %s742_s25 = scalar_lea.vmem (%p29_p3), %s836_s0, %s618_s21  ;;  %s134_s26 = scalar_lea.vmem (%p29_p3), [#allocation2], %s537_s22 }
   0xf   : > { %v150_v0 = vld [vmem:[%s742_s25] sm:$0xff] (%p29_p3)  ;;  %v152_v1 = vld [vmem:[%s742_s25 + $0x8] sm:$0xff] (%p29_p3)  ;;  %v154_v2 = vld [vmem:[%s742_s25 + $0x10] sm:$0xff] (%p29_p3) }
  0x10   : > { %151 = vst [vmem:[%s134_s26] sm:$0xff] (%p29_p3), %v150_v0  ;;  %v156_v3 = vld [vmem:[%s742_s25 + $0x18] sm:$0xff] (%p29_p3)  ;;  %v158_v4 = vld [vmem:[%s742_s25 + $0x40] sm:$0xff] (%p29_p3)  ;;  %v160_v5 = vld [vmem:[%s742_s25 + $0x48] sm:$0xff] (%p29_p3) }
  0x11   : > { %153 = vst [vmem:[%s134_s26 + $0x8] sm:$0xff] %v152_v1  ;;  %v162_v6 = vld [vmem:[%s742_s25 + $0x50] sm:$0xff]  ;;  %v164_v7 = vld [vmem:[%s742_s25 + $0x58] sm:$0xff]  ;;  %v166_v8 = vld [vmem:[%s742_s25 + $0x80] sm:$0xff] }
  0x12   : > { %155 = vst [vmem:[%s134_s26 + $0x10] sm:$0xff] %v154_v2  ;;  %v168_v9 = vld [vmem:[%s742_s25 + $0x88] sm:$0xff]  ;;  %v170_v10 = vld [vmem:[%s742_s25 + $0x90] sm:$0xff]  ;;  %v172_v11 = vld [vmem:[%s742_s25 + $0x98] sm:$0xff] }
  0x13   : > { %157 = vst [vmem:[%s134_s26 + $0x18] sm:$0xff] %v156_v3  ;;  %v174_v12 = vld [vmem:[%s742_s25 + $0xc0] sm:$0xff]  ;;  %v176_v13 = vld [vmem:[%s742_s25 + $0xc8] sm:$0xff]  ;;  %v178_v14 = vld [vmem:[%s742_s25 + $0xd0] sm:$0xff] }
  0x14   : > { %159 = vst [vmem:[%s134_s26 + $0x20] sm:$0xff] %v158_v4  ;;  %v180_v15 = vld [vmem:[%s742_s25 + $0xd8] sm:$0xff] }
  0x15   : > { %161 = vst [vmem:[%s134_s26 + $0x28] sm:$0xff] %v160_v5 }
  0x16   : > { %163 = vst [vmem:[%s134_s26 + $0x30] sm:$0xff] %v162_v6 }
  0x17   : > { %165 = vst [vmem:[%s134_s26 + $0x38] sm:$0xff] %v164_v7 }
  0x18   : > { %167 = vst [vmem:[%s134_s26 + $0x40] sm:$0xff] %v166_v8 }
  0x19   : > { %169 = vst [vmem:[%s134_s26 + $0x48] sm:$0xff] %v168_v9 }
  0x1a   : > { %171 = vst [vmem:[%s134_s26 + $0x50] sm:$0xff] %v170_v10 }
  0x1b   : > { %173 = vst [vmem:[%s134_s26 + $0x58] sm:$0xff] %v172_v11 }
  0x1c   : > { %175 = vst [vmem:[%s134_s26 + $0x60] sm:$0xff] %v174_v12 }
  0x1d   : > { %177 = vst [vmem:[%s134_s26 + $0x68] sm:$0xff] %v176_v13 }
  0x1e   : > { %179 = vst [vmem:[%s134_s26 + $0x70] sm:$0xff] %v178_v14 }
  0x1f   : > { %181 = vst [vmem:[%s134_s26 + $0x78] sm:$0xff] %v180_v15 }
  0x20 PF: > { %p540_p5 = scmp.ge.s32.totalorder %s684_s14, 1  ;;  %p186_p6 = scmp.lt.s32.totalorder %s684_s14, 3 }
  0x22   : > { %p187_p7 = pnand %p540_p5, %p186_p6 }
  0x23   : > { %s193_s27 = sand.u32 (!%p187_p7), 1, %s676_s12   ;;  %s542_s7 = sshll.u32 (!%p187_p7), %s533_s15, 1 }
  0x24   : > { %190 = sbr.rel (%p187_p7) target bundleno = 216 (0xd8), region = 51  ;;  %s541_s28 = sshll.u32 (!%p187_p7), %s193_s27, 7 }
  0x25   : > { %s768_s4 = scalar_lea.vmem (!%p187_p7), [#allocation2], %s541_s28  ;;  %p218_p8 = scmp.lt.s32.totalorder (!%p187_p7), %s542_s7, 3 }
  0x29   : > { %vm323_vm0 = vcmask 1043456   ;;  %vm324_vm1 = vcmask 1044480   ;;  %v686_v16 = vmov 65535   ;;  %v241_v18 = vld [vmem:[%s838_s2] sm:$0x3f]  ;;  %v687_v20 = vmov 0  }
  0x2a   : > { %v325_v17 = vsel %vm323_vm0, 4294967295, %v686_v16  ;;  %661 = vset.pattern.permute.xlu0 %v687_v20  ;;  %v578_v21 = vld [vmem:[%s768_s4 + $0x40] sm:$0xf]  ;;  %v627_v23 = vld [vmem:[%s768_s4 + $0x44] sm:$0xf]  ;;  %vm319_vm2 = vcmask 203776  }
  0x2b   : > { %v766_v19 = vsel %vm324_vm1, %v325_v17, 0  ;;  %v631_v22 = vld [vmem:[%s768_s4 + $0x5c] sm:$0x10]  ;;  %244 = vperm.xlu0 %661, %v241_v18   ;;  %v580_v25 = vld [vmem:[%s768_s4 + $0x60] sm:$0x10]  ;;  %s844_s7 = smov (!%p218_p8, %s542_s7), 3 }
  0x2c   : > { %v579_v24 = vor.u32 %v631_v22, %v578_v21  ;;  %v586_v26 = vld [vmem:[%s768_s4 + $0x48] sm:$0xf]  ;;  %v583_v28 = vor.u32 %v627_v23, %v580_v25  ;;  %v628_v30 = vld [vmem:[%s768_s4 + $0x4c] sm:$0xf]  ;;  %v546_v32 = vld [vmem:[%s768_s4] sm:$0xf] }
  0x2d   : > { %v632_v27 = vld [vmem:[%s768_s4 + $0x64] sm:$0x10]  ;;  %v588_v31 = vld [vmem:[%s768_s4 + $0x68] sm:$0x10]  ;;  %v623_v35 = vld [vmem:[%s768_s4 + $0x1c] sm:$0xf0] }
  0x2e   : > { %v587_v29 = vor.u32 %v632_v27, %v586_v26  ;;  %v328_v33 = vand.u32 %v579_v24, %v766_v19  ;;  %v591_v34 = vor.u32 %v628_v30, %v588_v31  ;;  %v619_v36 = vld [vmem:[%s768_s4 + $0x4] sm:$0xf]  ;;  %v331_v38 = vand.u32 %v583_v28, %v766_v19  ;;  %v554_v40 = vld [vmem:[%s768_s4 + $0x8] sm:$0xf]  ;;  %v620_v42 = vld [vmem:[%s768_s4 + $0xc] sm:$0xf] }
  0x2f   : > { %v548_v37 = vld [vmem:[%s768_s4 + $0x20] sm:$0xf0]  ;;  %v624_v41 = vld [vmem:[%s768_s4 + $0x24] sm:$0xf0]  ;;  %v547_v44 = vor.u32 %v623_v35, %v546_v32  ;;  %v556_v45 = vld [vmem:[%s768_s4 + $0x28] sm:$0xf0] }
  0x30   : > { %v334_v39 = vand.u32 %v587_v29, %v766_v19  ;;  %357 = vmatpush.bf16.msra.mxu0 %v328_v33  ;;  %v337_v43 = vand.u32 %v591_v34, %v766_v19  ;;  %v602_v46 = vld [vmem:[%s768_s4 + $0x58] sm:$0xf]  ;;  %370 = vmatpush.bf16.msra.mxu1 %v331_v38  ;;  %v551_v48 = vor.u32 %v619_v36, %v548_v37  ;;  %v630_v51 = vld [vmem:[%s768_s4 + $0x5c] sm:$0xf]  ;;  %v594_v53 = vld [vmem:[%s768_s4 + $0x50] sm:$0xf] }
  0x31   : > { %v634_v47 = vld [vmem:[%s768_s4 + $0x74] sm:$0x10]  ;;  %v555_v49 = vor.u32 %v624_v41, %v554_v40  ;;  %v604_v52 = vld [vmem:[%s768_s4 + $0x78] sm:$0x10]  ;;  %v559_v54 = vor.u32 %v620_v42, %v556_v45  ;;  %v633_v56 = vld [vmem:[%s768_s4 + $0x6c] sm:$0x10] }
  0x32   : > { %383 = vmatpush.bf16.msra.mxu2 %v334_v39  ;;  %v603_v50 = vor.u32 %v634_v47, %v602_v46  ;;  %396 = vmatpush.bf16.msra.mxu3 %v337_v43  ;;  %v607_v55 = vor.u32 %v630_v51, %v604_v52  ;;  %v629_v57 = vld [vmem:[%s768_s4 + $0x54] sm:$0xf]  ;;  %v224_v59 = vld [vmem:[%s837_s1] sm:$0x7]  ;;  %v595_v61 = vor.u32 %v633_v56, %v594_v53  ;;  %v570_v63 = vld [vmem:[%s768_s4 + $0x18] sm:$0xf] }
  0x33   : > { %v596_v58 = vld [vmem:[%s768_s4 + $0x70] sm:$0x10]  ;;  %v626_v0 = vld [vmem:[%s768_s4 + $0x34] sm:$0xf0]  ;;  %v622_v2 = vld [vmem:[%s768_s4 + $0x1c] sm:$0xf] }
  0x34   : > { %v346_v60 = vand.u32 %v603_v50, %v766_v19  ;;  %v599_v62 = vor.u32 %v629_v57, %v596_v58  ;;  %358 = vmatpush.bf16.msra.mxu0 %v547_v44  ;;  %v349_v1 = vand.u32 %v607_v55, %v766_v19  ;;  %v572_v3 = vld [vmem:[%s768_s4 + $0x38] sm:$0xf0]  ;;  %371 = vmatpush.bf16.msra.mxu1 %v551_v48  ;;  %v562_v7 = vld [vmem:[%s768_s4 + $0x10] sm:$0xf]  ;;  %v621_v10 = vld [vmem:[%s768_s4 + $0x14] sm:$0xf] }
  0x35   : > { %v340_v4 = vand.u32 %v595_v61, %v766_v19  ;;  %v571_v6 = vor.u32 %v626_v0, %v570_v63  ;;  %v625_v8 = vld [vmem:[%s768_s4 + $0x2c] sm:$0xf0]  ;;  %v575_v9 = vor.u32 %v622_v2, %v572_v3  ;;  %v564_v11 = vld [vmem:[%s768_s4 + $0x30] sm:$0xf0]  ;;  %s543_s8 = sshll.u32 %s844_s7, 2 }
  0x36   : > { %384 = vmatpush.bf16.msra.mxu2 %v555_v49  ;;  %397 = vmatpush.bf16.msra.mxu3 %v559_v54  ;;  %v343_v5 = vand.u32 %v599_v62, %v766_v19  ;;  %v563_v12 = vor.u32 %v625_v8, %v562_v7  ;;  %v567_v13 = vor.u32 %v621_v10, %v564_v11  ;;  %s221_s11 = scalar_lea.vmem %s839_s3, %s543_s8 }
  0x37   : > { %608 = vmatmul.msk.bf16.vlgmr.msra.gmra.mxu0 %vm319_vm2, %v224_v59  ;;  %609 = vmatmul.msk.bf16.vlgmr.msra.gmra.mxu1 %vm319_vm2, %v224_v59 }
  0x38   : > { %409 = vmatpush.bf16.msrb.mxu0 %v340_v4  ;;  %422 = vmatpush.bf16.msrb.mxu1 %v343_v5 }
  0x39   : > { %610 = vmatmul.msk.bf16.vlgmr.msra.gmra.mxu2 %vm319_vm2, %v224_v59  ;;  %611 = vmatmul.msk.bf16.vlgmr.msra.gmra.mxu3 %vm319_vm2, %v224_v59 }
  0x3a   : > { %435 = vmatpush.bf16.msrb.mxu2 %v346_v60  ;;  %448 = vmatpush.bf16.msrb.mxu3 %v349_v1 }
  0x3c   : > { %410 = vmatpush.bf16.msrb.mxu0 %v563_v12  ;;  %423 = vmatpush.bf16.msrb.mxu1 %v567_v13 }
  0x3e   : > { %436 = vmatpush.bf16.msrb.mxu2 %v571_v6  ;;  %449 = vmatpush.bf16.msrb.mxu3 %v575_v9 }
  0x47   : > { %612 = vmatmul.msk.bf16.vlgmr.msrb.gmra.mxu0 %vm319_vm2, %v224_v59  ;;  %613 = vmatmul.msk.bf16.vlgmr.msrb.gmra.mxu1 %vm319_vm2, %v224_v59 }
  0x49   : > { %614 = vmatmul.msk.bf16.vlgmr.msrb.gmra.mxu2 %vm319_vm2, %v224_v59  ;;  %615 = vmatmul.msk.bf16.vlgmr.msrb.gmra.mxu3 %vm319_vm2, %v224_v59 }
  0x9d   : > { %v245_v23 = vpop.permute.xlu0 %244 }
  0xb4   : > { %v360_v14 = vpop.f32.mrf.mxu0  ;;  %v373_v15 = vpop.f32.mrf.mxu1 }
  0xb5   : > { %v361_v25 = vadd.f32 %v360_v14, %v245_v23  ;;  %v374_v28 = vadd.f32 %v373_v15, %v245_v23 }
  0xb7   : > { %v455_v32 = vmax.f32 %v361_v25, 0.0  ;;  %v456_v38 = vmax.f32 %v374_v28, 0.0 }
  0xbc   : > { %v386_v16 = vpop.f32.mrf.mxu2  ;;  %v399_v17 = vpop.f32.mrf.mxu3 }
  0xbd   : > { %v362_v18 = vpop.f32.mrf.mxu0  ;;  %v375_v19 = vpop.f32.mrf.mxu1  ;;  %v387_v26 = vadd.f32 %v386_v16, %v245_v23  ;;  %v400_v29 = vadd.f32 %v399_v17, %v245_v23 }
  0xbf   : > { %v457_v33 = vmax.f32 %v387_v26, 0.0  ;;  %v458_v39 = vmax.f32 %v400_v29, 0.0 }
  0xc1   : > { %v463_v45 = vmax.f32 %v455_v32, %v457_v33  ;;  %v464_v47 = vmax.f32 %v456_v38, %v458_v39 }
  0xc4   : > { %v388_v20 = vpop.f32.mrf.mxu2  ;;  %v401_v21 = vpop.f32.mrf.mxu3 }
  0xc5   : > { %v412_v22 = vpop.f32.mrf.mxu0  ;;  %v425_v24 = vpop.f32.mrf.mxu1 }
  0xc6   : > { %v413_v27 = vadd.f32 %v412_v22, %v245_v23  ;;  %v426_v30 = vadd.f32 %v425_v24, %v245_v23 }
  0xc8   : > { %v459_v34 = vmax.f32 %v413_v27, 0.0  ;;  %v460_v40 = vmax.f32 %v426_v30, 0.0 }
  0xcc   : > { %v438_v31 = vpop.f32.mrf.mxu2  ;;  %v451_v36 = vpop.f32.mrf.mxu3 }
  0xcd   : > { %v439_v35 = vadd.f32 %v438_v31, %v245_v23  ;;  %v414_v37 = vpop.f32.mrf.mxu0  ;;  %v452_v41 = vadd.f32 %v451_v36, %v245_v23  ;;  %v427_v42 = vpop.f32.mrf.mxu1 }
  0xcf   : > { %v461_v43 = vmax.f32 %v439_v35, 0.0  ;;  %v462_v44 = vmax.f32 %v452_v41, 0.0 }
  0xd1   : > { %v465_v46 = vmax.f32 %v459_v34, %v461_v43  ;;  %v466_v48 = vmax.f32 %v460_v40, %v462_v44 }
  0xd3   : > { %v467_v49 = vmax.f32 %v463_v45, %v465_v46  ;;  %v468_v50 = vmax.f32 %v464_v47, %v466_v48 }
  0xd4   : > { %v440_v51 = vpop.f32.mrf.mxu2  ;;  %v453_v52 = vpop.f32.mrf.mxu3 }
  0xd5   : > { %v469_v53 = vpack.c.bf16 %v468_v50, %v467_v49 }
  0xd7   : > { %470 = vst [vmem:[%s221_s11] sm:$0x77] %v469_v53 }
  0xd8 PF: > { %p10_p9 = scmp.ge.s32.totalorder %s725_s16, 4   ;;  %s840_s12 = smov %s680_s13 }
  0xd9   : > { %s841_s13 = smov %s734_s19  ;;  %s842_s14 = smov %s725_s16 }
  0xda   :  { %12 = sbr.rel (!%p10_p9) target bundleno = 2 (0x2), region = 90 }

// kernel: lenet_forward.4
= control target key start
LH: loop header
LB: loop body
LE: loop exit
PB: predicated region body
PF: predicated region fallthrough
CT: control target
= control target key end

     0   :  { %vm270_vm0 = vcmask 1042432   ;;  %vm266_vm1 = vcmask 179200   ;;  %s904_s0 = inlined_call_operand.vmem [shape: bf16[150,512], index: 0, kind: input, shape index: {}]   ;;  %s905_s1 = inlined_call_operand.vmem [shape: bf16[16,150], index: 1, kind: input, shape index: {}]   ;;  %s906_s2 = inlined_call_operand.vmem [shape: f32[16,1], index: 2, kind: input, shape index: {}]   ;;  %s907_s3 = inlined_call_operand.vmem [shape: bf16[16,128], index: 3, kind: output, shape index: {}]  }
   0x1   :  { %v539_v0 = vld [vmem:[%s904_s0 + $0xe0] sm:$0xf]  ;;  %v605_v1 = vld [vmem:[%s904_s0 + $0xec] sm:$0xf0]  ;;  %v603_v2 = vld [vmem:[%s904_s0 + $0xe4] sm:$0xf] }
   0x2   :  { %v540_v3 = vor.u32 %v605_v1, %v539_v0  ;;  %v541_v4 = vld [vmem:[%s904_s0 + $0xf0] sm:$0xf0]  ;;  %v654_v5 = vld [vmem:[%s904_s0 + $0x120] sm:$0x77]  ;;  %v659_v6 = vld [vmem:[%s904_s0 + $0x128] sm:$0x77] }
   0x3   :  { %v544_v7 = vor.u32 %v603_v2, %v541_v4  ;;  %v186_v8 = vunpack.c.l.b16 %v654_v5  ;;  %v188_v9 = vunpack.c.l.b16 %v659_v6  ;;  %v523_v10 = vld [vmem:[%s904_s0 + $0xc0] sm:$0xf]  ;;  %v601_v11 = vld [vmem:[%s904_s0 + $0xcc] sm:$0xf0]  ;;  %v599_v12 = vld [vmem:[%s904_s0 + $0xc4] sm:$0xf] }
   0x4   :  { %283 = vmatpush.bf16.msra.mxu0 %v540_v3  ;;  %v525_v13 = vld [vmem:[%s904_s0 + $0xd0] sm:$0xf0]  ;;  %v555_v14 = vld [vmem:[%s904_s0 + $0x100] sm:$0xf]  ;;  %v609_v15 = vld [vmem:[%s904_s0 + $0x10c] sm:$0xf0]  ;;  %v524_v18 = vor.u32 %v601_v11, %v523_v10 }
   0x5   :  { %311 = vmatpush.bf16.msra.mxu2 %v544_v7  ;;  %v226_v16 = vpack.c.b16 %v186_v8, %v186_v8  ;;  %v228_v17 = vpack.c.b16 %v188_v9, %v188_v9  ;;  %v528_v19 = vor.u32 %v599_v12, %v525_v13  ;;  %v563_v20 = vld [vmem:[%s904_s0 + $0x108] sm:$0xf]  ;;  %v610_v21 = vld [vmem:[%s904_s0 + $0x114] sm:$0xf0]  ;;  %v507_v22 = vld [vmem:[%s904_s0 + $0xa0] sm:$0xf]  ;;  %v556_v30 = vor.u32 %v609_v15, %v555_v14 }
   0x6   :  { %v597_v23 = vld [vmem:[%s904_s0 + $0xac] sm:$0xf0]  ;;  %v595_v24 = vld [vmem:[%s904_s0 + $0xa4] sm:$0xf]  ;;  %v509_v25 = vld [vmem:[%s904_s0 + $0xb0] sm:$0xf0]  ;;  %v564_v31 = vor.u32 %v610_v21, %v563_v20  ;;  %v187_v15 = vunpack.c.h.b16 %v654_v5  ;;  %v189_v21 = vunpack.c.h.b16 %v659_v6 }
   0x7   :  { %v272_v26 = vsel %vm270_vm0, %v226_v16, 0  ;;  %v278_v27 = vsel %vm270_vm0, %v228_v17, 0  ;;  %v547_v28 = vld [vmem:[%s904_s0 + $0xe8] sm:$0xf]  ;;  %v606_v29 = vld [vmem:[%s904_s0 + $0xf4] sm:$0xf0]  ;;  %v508_v34 = vor.u32 %v597_v23, %v507_v22  ;;  %v512_v35 = vor.u32 %v595_v24, %v509_v25 }
   0x8   :  { %303 = vmatpush.bf16.msra.mxu1 %v272_v26  ;;  %359 = vmatpush.bf16.msra.mxu3 %v278_v27  ;;  %v604_v32 = vld [vmem:[%s904_s0 + $0xec] sm:$0xf]  ;;  %v549_v33 = vld [vmem:[%s904_s0 + $0xf8] sm:$0xf0]  ;;  %v491_v36 = vld [vmem:[%s904_s0 + $0x80] sm:$0xf]  ;;  %v548_v38 = vor.u32 %v606_v29, %v547_v28  ;;  %v227_v28 = vpack.c.b16 %v187_v15, %v187_v15 }
   0x9   :  { %284 = vmatpush.bf16.msra.mxu0 %v524_v18  ;;  %312 = vmatpush.bf16.msra.mxu2 %v528_v19  ;;  %v593_v37 = vld [vmem:[%s904_s0 + $0x8c] sm:$0xf0]  ;;  %v552_v39 = vor.u32 %v604_v32, %v549_v33  ;;  %v591_v40 = vld [vmem:[%s904_s0 + $0x84] sm:$0xf]  ;;  %v493_v41 = vld [vmem:[%s904_s0 + $0x90] sm:$0xf0] }
   0xa   :  { %v531_v42 = vld [vmem:[%s904_s0 + $0xc8] sm:$0xf]  ;;  %v602_v43 = vld [vmem:[%s904_s0 + $0xd4] sm:$0xf0]  ;;  %v600_v44 = vld [vmem:[%s904_s0 + $0xcc] sm:$0xf]  ;;  %v492_v46 = vor.u32 %v593_v37, %v491_v36  ;;  %v496_v47 = vor.u32 %v591_v40, %v493_v41 }
   0xb   :  { %v533_v45 = vld [vmem:[%s904_s0 + $0xd8] sm:$0xf0]  ;;  %v475_v48 = vld [vmem:[%s904_s0 + $0x60] sm:$0xf]  ;;  %v589_v49 = vld [vmem:[%s904_s0 + $0x6c] sm:$0xf0]  ;;  %v532_v50 = vor.u32 %v602_v43, %v531_v42 }
   0xc   :  { %304 = vmatpush.bf16.msra.mxu1 %v556_v30  ;;  %360 = vmatpush.bf16.msra.mxu3 %v564_v31  ;;  %v536_v51 = vor.u32 %v600_v44, %v533_v45  ;;  %v587_v52 = vld [vmem:[%s904_s0 + $0x64] sm:$0xf]  ;;  %v477_v53 = vld [vmem:[%s904_s0 + $0x70] sm:$0xf0]  ;;  %v515_v54 = vld [vmem:[%s904_s0 + $0xa8] sm:$0xf]  ;;  %v476_v59 = vor.u32 %v589_v49, %v475_v48 }
   0xd   :  { %285 = vmatpush.bf16.msra.mxu0 %v508_v34  ;;  %313 = vmatpush.bf16.msra.mxu2 %v512_v35  ;;  %v598_v55 = vld [vmem:[%s904_s0 + $0xb4] sm:$0xf0]  ;;  %v596_v56 = vld [vmem:[%s904_s0 + $0xac] sm:$0xf]  ;;  %v517_v57 = vld [vmem:[%s904_s0 + $0xb8] sm:$0xf0]  ;;  %v480_v60 = vor.u32 %v587_v52, %v477_v53  ;;  %v229_v34 = vpack.c.b16 %v189_v21, %v189_v21 }
   0xe   :  { %v573_v58 = vld [vmem:[%s905_s1 + $0x4] sm:$0xf]  ;;  %v459_v61 = vld [vmem:[%s904_s0 + $0x40] sm:$0xf]  ;;  %v585_v62 = vld [vmem:[%s904_s0 + $0x4c] sm:$0xf0]  ;;  %v516_v0 = vor.u32 %v598_v55, %v515_v54  ;;  %v520_v1 = vor.u32 %v596_v56, %v517_v57 }
   0xf   :  { %v421_v63 = vld [vmem:[%s905_s1 + $0x8] sm:$0xf0]  ;;  %v583_v2 = vld [vmem:[%s904_s0 + $0x44] sm:$0xf]  ;;  %v461_v3 = vld [vmem:[%s904_s0 + $0x50] sm:$0xf0]  ;;  %v460_v11 = vor.u32 %v585_v62, %v459_v61 }
  0x10   :  { %339 = vmatpush.bf16.msrb.mxu1 %v548_v38  ;;  %367 = vmatpush.bf16.msrb.mxu3 %v552_v39  ;;  %v499_v4 = vld [vmem:[%s904_s0 + $0x88] sm:$0xf]  ;;  %v782_v7 = vor.u32 %v573_v58, %v421_v63  ;;  %v594_v8 = vld [vmem:[%s904_s0 + $0x94] sm:$0xf0]  ;;  %v592_v9 = vld [vmem:[%s904_s0 + $0x8c] sm:$0xf]  ;;  %v464_v12 = vor.u32 %v583_v2, %v461_v3 }
  0x11   :  { %286 = vmatpush.bf16.msra.mxu0 %v492_v46  ;;  %314 = vmatpush.bf16.msra.mxu2 %v496_v47  ;;  %v501_v10 = vld [vmem:[%s904_s0 + $0x98] sm:$0xf0]  ;;  %v443_v13 = vld [vmem:[%s904_s0 + $0x20] sm:$0xf]  ;;  %v581_v14 = vld [vmem:[%s904_s0 + $0x2c] sm:$0xf0]  ;;  %v500_v16 = vor.u32 %v594_v8, %v499_v4 }
  0x12   :  { %571 = vmatmul.msk.bf16.vlgmr.msra.gmra.mxu3 %vm266_vm1, %v782_v7  ;;  %569 = vmatmul.msk.bf16.vlgmr.msra.gmra.mxu1 %vm266_vm1, %v782_v7  ;;  %v504_v17 = vor.u32 %v592_v9, %v501_v10  ;;  %v579_v18 = vld [vmem:[%s904_s0 + $0x24] sm:$0xf]  ;;  %v445_v19 = vld [vmem:[%s904_s0 + $0x30] sm:$0xf0]  ;;  %v483_v20 = vld [vmem:[%s904_s0 + $0x68] sm:$0xf]  ;;  %v444_v24 = vor.u32 %v581_v14, %v443_v13 }
  0x13   :  { %v590_v5 = vld [vmem:[%s904_s0 + $0x74] sm:$0xf0]  ;;  %v588_v22 = vld [vmem:[%s904_s0 + $0x6c] sm:$0xf]  ;;  %v485_v23 = vld [vmem:[%s904_s0 + $0x78] sm:$0xf0]  ;;  %v448_v25 = vor.u32 %v579_v18, %v445_v19 }
  0x14   :  { %340 = vmatpush.bf16.msrb.mxu1 %v532_v50  ;;  %368 = vmatpush.bf16.msrb.mxu3 %v536_v51  ;;  %v427_v6 = vld [vmem:[%s904_s0] sm:$0xf]  ;;  %v577_v26 = vld [vmem:[%s904_s0 + $0xc] sm:$0xf0]  ;;  %v575_v27 = vld [vmem:[%s904_s0 + $0x4] sm:$0xf]  ;;  %v484_v29 = vor.u32 %v590_v5, %v483_v20  ;;  %v488_v30 = vor.u32 %v588_v22, %v485_v23 }
  0x15   :  { %287 = vmatpush.bf16.msra.mxu0 %v476_v59  ;;  %315 = vmatpush.bf16.msra.mxu2 %v480_v60  ;;  %v429_v31 = vld [vmem:[%s904_s0 + $0x10] sm:$0xf0]  ;;  %v467_v32 = vld [vmem:[%s904_s0 + $0x48] sm:$0xf]  ;;  %v586_v33 = vld [vmem:[%s904_s0 + $0x54] sm:$0xf0]  ;;  %v428_v39 = vor.u32 %v577_v26, %v427_v6 }
  0x16   :  { %v584_v35 = vld [vmem:[%s904_s0 + $0x4c] sm:$0xf]  ;;  %v469_v36 = vld [vmem:[%s904_s0 + $0x58] sm:$0xf0]  ;;  %v618_v37 = vmov 0   ;;  %v55_v38 = vld [vmem:[%s906_s2] sm:$0xff]  ;;  %v432_v40 = vor.u32 %v575_v27, %v429_v31  ;;  %v468_v43 = vor.u32 %v586_v33, %v467_v32 }
  0x17   :  { %617 = vset.pattern.permute.xlu0 %v618_v37  ;;  %v419_v41 = vld [vmem:[%s905_s1] sm:$0xf]  ;;  %v574_v42 = vld [vmem:[%s905_s1 + $0x4] sm:$0xf0]  ;;  %v472_v44 = vor.u32 %v584_v35, %v469_v36  ;;  %v275_v45 = vsel %vm270_vm0, %v227_v28, 0  ;;  %v281_v48 = vsel %vm270_vm0, %v229_v34, 0 }
  0x18   :  { %341 = vmatpush.bf16.msrb.mxu1 %v516_v0  ;;  %369 = vmatpush.bf16.msrb.mxu3 %v520_v1  ;;  %v451_v46 = vld [vmem:[%s904_s0 + $0x28] sm:$0xf]  ;;  %v582_v47 = vld [vmem:[%s904_s0 + $0x34] sm:$0xf0]  ;;  %v580_v49 = vld [vmem:[%s904_s0 + $0x2c] sm:$0xf]  ;;  %v420_v52 = vor.u32 %v574_v42, %v419_v41 }
  0x19   :  { %288 = vmatpush.bf16.msra.mxu0 %v460_v11  ;;  %316 = vmatpush.bf16.msra.mxu2 %v464_v12  ;;  %v453_v50 = vld [vmem:[%s904_s0 + $0x38] sm:$0xf0]  ;;  %v607_v51 = vld [vmem:[%s904_s0 + $0x104] sm:$0xf]  ;;  %v557_v53 = vld [vmem:[%s904_s0 + $0x110] sm:$0xf0]  ;;  %v452_v56 = vor.u32 %v582_v47, %v451_v46 }
  0x1a   :  { %59 = vperm.xlu0 %617, %v55_v38   ;;  %v608_v54 = vld [vmem:[%s904_s0 + $0x10c] sm:$0xf]  ;;  %v565_v55 = vld [vmem:[%s904_s0 + $0x118] sm:$0xf0]  ;;  %v456_v57 = vor.u32 %v580_v49, %v453_v50  ;;  %v435_v58 = vld [vmem:[%s904_s0 + $0x8] sm:$0xf]  ;;  %v560_v62 = vor.u32 %v607_v51, %v557_v53 }
  0x1b   :  { %v578_v59 = vld [vmem:[%s904_s0 + $0x14] sm:$0xf0]  ;;  %v576_v60 = vld [vmem:[%s904_s0 + $0xc] sm:$0xf]  ;;  %v437_v61 = vld [vmem:[%s904_s0 + $0x18] sm:$0xf0]  ;;  %v568_v63 = vor.u32 %v608_v54, %v565_v55 }
  0x1c   :  { %342 = vmatpush.bf16.msrb.mxu1 %v500_v16  ;;  %370 = vmatpush.bf16.msrb.mxu3 %v504_v17  ;;  %v56_v0 = vld [vmem:[%s906_s2 + $0x8] sm:$0xff]  ;;  %v436_v1 = vor.u32 %v578_v59, %v435_v58  ;;  %v440_v2 = vor.u32 %v576_v60, %v437_v61 }
  0x1d   :  { %289 = vmatpush.bf16.msra.mxu0 %v444_v24  ;;  %317 = vmatpush.bf16.msra.mxu2 %v448_v25 }
  0x20   :  { %343 = vmatpush.bf16.msrb.mxu1 %v484_v29  ;;  %371 = vmatpush.bf16.msrb.mxu3 %v488_v30 }
  0x21   :  { %290 = vmatpush.bf16.msra.mxu0 %v428_v39  ;;  %318 = vmatpush.bf16.msra.mxu2 %v432_v40 }
  0x22   :  { %64 = vperm.xlu0 %617, %v56_v0  }
  0x24   :  { %344 = vmatpush.bf16.msrb.mxu1 %v468_v43  ;;  %372 = vmatpush.bf16.msrb.mxu3 %v472_v44 }
  0x25   :  { %331 = vmatpush.bf16.msrb.mxu2 %v275_v45  ;;  %387 = vmatpush.bf16.msrb.mxu0 %v281_v48 }
  0x26   :  { %291 = vmatmul.bf16.vlgmr.msra.gmra.mxu0 %v420_v52  ;;  %319 = vmatmul.bf16.vlgmr.msra.gmra.mxu2 %v420_v52 }
  0x28   :  { %345 = vmatpush.bf16.msrb.mxu1 %v452_v56  ;;  %373 = vmatpush.bf16.msrb.mxu3 %v456_v57 }
  0x29   :  { %332 = vmatpush.bf16.msrb.mxu2 %v560_v62  ;;  %388 = vmatpush.bf16.msrb.mxu0 %v568_v63 }
  0x2c   :  { %346 = vmatpush.bf16.msrb.mxu1 %v436_v1  ;;  %374 = vmatpush.bf16.msrb.mxu3 %v440_v2 }
  0x2f   :  { %347 = vmatmul.bf16.vlgmr.msrb.gmra.mxu1 %v420_v52  ;;  %375 = vmatmul.bf16.vlgmr.msrb.gmra.mxu3 %v420_v52 }
  0x36   :  { %570 = vmatmul.msk.bf16.vlgmr.msrb.gmra.mxu2 %vm266_vm1, %v782_v7  ;;  %572 = vmatmul.msk.bf16.vlgmr.msrb.gmra.mxu0 %vm266_vm1, %v782_v7 }
  0x8c   :  { %v60_v13 = vpop.permute.xlu0 %59 }
  0x8f   :  { %v306_v3 = vpop.f32.mrf.mxu1 }
  0x94   :  { %v65_v18 = vpop.permute.xlu0 %64 }
  0x95   :  { %v362_v4 = vpop.f32.mrf.mxu3 }
  0x97   :  { %v308_v9 = vpop.f32.mrf.mxu1 }
  0x9d   :  { %v364_v11 = vpop.f32.mrf.mxu3 }
  0xa3   :  { %v292_v8 = vpop.f32.mrf.mxu0 }
  0xa4   :  { %v293_v21 = vadd.f32 %v292_v8, %v60_v13 }
  0xa6   :  { %v307_v28 = vadd.f32 %v306_v3, %v293_v21 }
  0xa8   :  { %v395_v37 = vmax.f32 %v307_v28, 0.0 }
  0xa9   :  { %v320_v10 = vpop.f32.mrf.mxu2 }
  0xaa   :  { %v321_v5 = vadd.f32 %v320_v10, %v60_v13 }
  0xab   :  { %v294_v12 = vpop.f32.mrf.mxu0 }
  0xac   :  { %v348_v14 = vpop.f32.mrf.mxu1  ;;  %v295_v7 = vadd.f32 %v294_v12, %v65_v18 }
  0xad   :  { %v349_v6 = vadd.f32 %v348_v14, %v60_v13 }
  0xae   :  { %v309_v31 = vadd.f32 %v308_v9, %v295_v7 }
  0xaf   :  { %v363_v32 = vadd.f32 %v362_v4, %v349_v6 }
  0xb0   :  { %v399_v41 = vmax.f32 %v309_v31, 0.0 }
  0xb1   :  { %v322_v15 = vpop.f32.mrf.mxu2  ;;  %v397_v42 = vmax.f32 %v363_v32, 0.0 }
  0xb2   :  { %v376_v16 = vpop.f32.mrf.mxu3  ;;  %v323_v33 = vadd.f32 %v322_v15, %v65_v18 }
  0xb3   :  { %v390_v17 = vpop.f32.mrf.mxu0  ;;  %v377_v22 = vadd.f32 %v376_v16, %v60_v13 }
  0xb4   :  { %v350_v19 = vpop.f32.mrf.mxu1 }
  0xb5   :  { %v351_v26 = vadd.f32 %v350_v19, %v65_v18  ;;  %v391_v29 = vadd.f32 %v390_v17, %v377_v22 }
  0xb7   :  { %v365_v34 = vadd.f32 %v364_v11, %v351_v26  ;;  %v398_v38 = vmax.f32 %v391_v29, 0.0 }
  0xb9   :  { %v334_v20 = vpop.f32.mrf.mxu2  ;;  %v401_v43 = vmax.f32 %v365_v34, 0.0  ;;  %v405_v46 = vmax.f32 %v397_v42, %v398_v38 }
  0xba   :  { %v378_v23 = vpop.f32.mrf.mxu3  ;;  %v335_v27 = vadd.f32 %v334_v20, %v321_v5 }
  0xbb   :  { %v379_v24 = vadd.f32 %v378_v23, %v65_v18  ;;  %v392_v25 = vpop.f32.mrf.mxu0 }
  0xbc   :  { %v396_v35 = vmax.f32 %v335_v27, 0.0 }
  0xbd   :  { %v393_v30 = vadd.f32 %v392_v25, %v379_v24 }
  0xbe   :  { %v403_v44 = vmax.f32 %v395_v37, %v396_v35 }
  0xbf   :  { %v402_v39 = vmax.f32 %v393_v30, 0.0 }
  0xc0   :  { %v407_v49 = vmax.f32 %v403_v44, %v405_v46 }
  0xc1   :  { %v336_v36 = vpop.f32.mrf.mxu2  ;;  %v406_v47 = vmax.f32 %v401_v43, %v402_v39 }
  0xc2   :  { %v337_v40 = vadd.f32 %v336_v36, %v323_v33 }
  0xc4   :  { %v400_v45 = vmax.f32 %v337_v40, 0.0 }
  0xc6   :  { %v404_v48 = vmax.f32 %v399_v41, %v400_v45 }
  0xc8   :  { %v408_v50 = vmax.f32 %v404_v48, %v406_v47 }
  0xca   :  { %v614_v51 = vpack.c.bf16 %v408_v50, %v407_v49 }
  0xcc   :  { %615 = vst [vmem:[%s907_s3] sm:$0xff] %v614_v51  }

// kernel: lenet_forward.5
= control target key start
LH: loop header
LB: loop body
LE: loop exit
PB: predicated region body
PF: predicated region fallthrough
CT: control target
= control target key end

     0   :  { %v893_v2 = vmov 0   ;;  %vm580_vm0 = vcmask 1043456   ;;  %vm561_vm1 = vcmask 982016   ;;  %vm662_vm2 = vcmask 1041408   ;;  %s1237_s0 = inlined_call_operand.vmem [shape: bf16[256,128], index: 0, kind: input, shape index: {}]   ;;  %s1238_s2 = inlined_call_operand.vmem [shape: f32[120,1], index: 2, kind: input, shape index: {}]   ;;  %s1239_s1 = inlined_call_operand.vmem [shape: bf16[120,256], index: 1, kind: input, shape index: {}]   ;;  %s1240_s4 = inlined_call_operand.vmem [shape: f32[84,1], index: 4, kind: input, shape index: {}]   ;;  %s1241_s6 = inlined_call_operand.vmem [shape: f32[10,1], index: 6, kind: input, shape index: {}]   ;;  %s1242_s3 = inlined_call_operand.vmem [shape: bf16[84,120], index: 3, kind: input, shape index: {}]   ;;  %s1243_s5 = inlined_call_operand.vmem [shape: bf16[10,84], index: 5, kind: input, shape index: {}]   ;;  %s1244_s7 = inlined_call_operand.vmem [shape: f32[10,128], index: 7, kind: output, shape index: {}]  }
   0x1   :  { %v858_v0 = vld [vmem:[%s1237_s0 + $0x38] sm:$0xff]  ;;  %891 = vset.pattern.permute.xlu1 %v893_v2  ;;  %890 = vset.pattern.permute.xlu0 %v893_v2  ;;  %v857_v3 = vld [vmem:[%s1237_s0 + $0x30] sm:$0xff]  ;;  %v87_v4 = vld [vmem:[%s1238_s2 + $0x68] sm:$0xff]  ;;  %vm658_vm3 = vcmask 687104  }
   0x2   :  { %v940_v1 = vld [vmem:[%s1237_s0 + $0x78] sm:$0xff]  ;;  %892 = vset.pattern.permute.xlu2 %v893_v2  ;;  %337 = vmatpush.bf16.msra.mxu0 %v858_v0  ;;  %v952_v5 = vld [vmem:[%s1237_s0 + $0x70] sm:$0xff]  ;;  %v856_v6 = vld [vmem:[%s1237_s0 + $0x28] sm:$0xff] }
   0x3   :  { %873 = vmatpush.bf16.msra.mxu3 %v858_v0  ;;  %385 = vmatpush.bf16.msra.mxu1 %v940_v1  ;;  %v961_v7 = vld [vmem:[%s1237_s0 + $0x68] sm:$0xff]  ;;  %v84_v8 = vld [vmem:[%s1238_s2 + $0x50] sm:$0xff]  ;;  %v85_v10 = vld [vmem:[%s1238_s2 + $0x58] sm:$0xff] }
   0x4   :  { %156 = vperm.xlu1 %891, %v87_v4   ;;  %v88_v9 = vld [vmem:[%s1238_s2 + $0x70] sm:$0xff]  ;;  %v855_v11 = vld [vmem:[%s1237_s0 + $0x20] sm:$0xff]  ;;  %146 = vperm.xlu2 %892, %v85_v10   ;;  %v854_v13 = vld [vmem:[%s1237_s0 + $0x18] sm:$0xff] }
   0x5   :  { %161 = vperm.xlu0 %890, %v88_v9   ;;  %v979_v12 = vld [vmem:[%s1237_s0 + $0x60] sm:$0xff]  ;;  %v991_v15 = vld [vmem:[%s1237_s0 + $0x58] sm:$0xff]  ;;  %v80_v16 = vld [vmem:[%s1238_s2 + $0x30] sm:$0xff] }
   0x6   :  { %338 = vmatpush.bf16.msra.mxu0 %v857_v3  ;;  %v86_v14 = vld [vmem:[%s1238_s2 + $0x60] sm:$0xff]  ;;  %v853_v17 = vld [vmem:[%s1237_s0 + $0x10] sm:$0xff]  ;;  %v852_v20 = vld [vmem:[%s1237_s0 + $0x8] sm:$0xff] }
   0x7   :  { %874 = vmatpush.bf16.msra.mxu3 %v857_v3  ;;  %386 = vmatpush.bf16.msra.mxu1 %v952_v5  ;;  %v82_v18 = vld [vmem:[%s1238_s2 + $0x40] sm:$0xff]  ;;  %v1006_v19 = vld [vmem:[%s1237_s0 + $0x50] sm:$0xff]  ;;  %v83_v21 = vld [vmem:[%s1238_s2 + $0x48] sm:$0xff] }
   0x8   :  { %v860_v22 = vld [vmem:[%s1237_s0 + $0x48] sm:$0xff]  ;;  %v851_v24 = vld [vmem:[%s1237_s0] sm:$0xff]  ;;  %v81_v26 = vld [vmem:[%s1238_s2 + $0x38] sm:$0xff] }
   0x9   :  { %v79_v23 = vld [vmem:[%s1238_s2 + $0x28] sm:$0xff]  ;;  %v688_v25 = vld [vmem:[%s1239_s1] sm:$0xf]  ;;  %v837_v31 = vld [vmem:[%s1239_s1 + $0x4] sm:$0xf] }
   0xa   :  { %339 = vmatpush.bf16.msra.mxu0 %v856_v6  ;;  %v838_v27 = vld [vmem:[%s1239_s1 + $0x4] sm:$0xf0]  ;;  %v736_v28 = vld [vmem:[%s1239_s1 + $0x60] sm:$0xf]  ;;  %v690_v32 = vld [vmem:[%s1239_s1 + $0x8] sm:$0xf0] }
   0xb   :  { %875 = vmatpush.bf16.msra.mxu3 %v856_v6  ;;  %387 = vmatpush.bf16.msra.mxu1 %v961_v7  ;;  %v850_v29 = vld [vmem:[%s1239_s1 + $0x64] sm:$0xf0]  ;;  %v859_v30 = vld [vmem:[%s1237_s0 + $0x40] sm:$0xff]  ;;  %v689_v33 = vor.u32 %v838_v27, %v688_v25  ;;  %v693_v35 = vor.u32 %v837_v31, %v690_v32  ;;  %v76_v38 = vld [vmem:[%s1238_s2 + $0x10] sm:$0xff] }
   0xc   :  { %141 = vperm.xlu1 %891, %v84_v8   ;;  %131 = vperm.xlu2 %892, %v82_v18   ;;  %v737_v34 = vor.u32 %v850_v29, %v736_v28  ;;  %v78_v36 = vld [vmem:[%s1238_s2 + $0x20] sm:$0xff]  ;;  %v41_v39 = vld [vmem:[%s1239_s1 + $0x70] sm:$0xff]  ;;  %v77_v40 = vld [vmem:[%s1238_s2 + $0x18] sm:$0xff] }
   0xd   :  { %151 = vperm.xlu0 %890, %v86_v14   ;;  %v74_v37 = vld [vmem:[%s1238_s2] sm:$0xff]  ;;  %v207_v41 = vunpack.c.l.b16 %v41_v39  ;;  %v75_v42 = vld [vmem:[%s1238_s2 + $0x8] sm:$0xff]  ;;  %v696_v43 = vld [vmem:[%s1239_s1 + $0x10] sm:$0xf]  ;;  %v208_v2 = vunpack.c.h.b16 %v41_v39 }
   0xe   :  { %340 = vmatpush.bf16.msra.mxu0 %v855_v11  ;;  %v840_v44 = vld [vmem:[%s1239_s1 + $0x14] sm:$0xf0]  ;;  %v839_v45 = vld [vmem:[%s1239_s1 + $0x14] sm:$0xf]  ;;  %v698_v46 = vld [vmem:[%s1239_s1 + $0x18] sm:$0xf0] }
   0xf   :  { %876 = vmatpush.bf16.msra.mxu3 %v855_v11  ;;  %388 = vmatpush.bf16.msra.mxu1 %v979_v12  ;;  %v697_v47 = vor.u32 %v840_v44, %v696_v43  ;;  %v223_v48 = vpack.c.b16 %v207_v41, %v207_v41  ;;  %v701_v49 = vor.u32 %v839_v45, %v698_v46  ;;  %v477_v50 = vld [vmem:[%s1240_s4 + $0x50] sm:$0xf]  ;;  %v475_v51 = vld [vmem:[%s1240_s4 + $0x40] sm:$0xff]  ;;  %v842_v54 = vld [vmem:[%s1239_s1 + $0x24] sm:$0xf0] }
  0x10   :  { %v473_v52 = vld [vmem:[%s1240_s4 + $0x30] sm:$0xff]  ;;  %v704_v53 = vld [vmem:[%s1239_s1 + $0x20] sm:$0xf]  ;;  %v849_v55 = vld [vmem:[%s1239_s1 + $0x64] sm:$0xf]  ;;  %v224_v8 = vpack.c.b16 %v208_v2, %v208_v2 }
  0x11   :  { %v738_v56 = vld [vmem:[%s1239_s1 + $0x68] sm:$0xf0]  ;;  %v841_v57 = vld [vmem:[%s1239_s1 + $0x24] sm:$0xf]  ;;  %v705_v59 = vor.u32 %v842_v54, %v704_v53  ;;  %v474_v63 = vld [vmem:[%s1240_s4 + $0x38] sm:$0xff] }
  0x12   :  { %341 = vmatpush.bf16.msra.mxu0 %v854_v13  ;;  %v706_v58 = vld [vmem:[%s1239_s1 + $0x28] sm:$0xf0]  ;;  %v741_v60 = vor.u32 %v849_v55, %v738_v56  ;;  %v467_v0 = vld [vmem:[%s1240_s4] sm:$0xff]  ;;  %v712_v3 = vld [vmem:[%s1239_s1 + $0x30] sm:$0xf] }
  0x13   :  { %877 = vmatpush.bf16.msra.mxu3 %v854_v13  ;;  %389 = vmatpush.bf16.msra.mxu1 %v991_v15  ;;  %v709_v61 = vor.u32 %v841_v57, %v706_v58  ;;  %v472_v62 = vld [vmem:[%s1240_s4 + $0x28] sm:$0xff]  ;;  %v844_v4 = vld [vmem:[%s1239_s1 + $0x34] sm:$0xf0]  ;;  %v714_v6 = vld [vmem:[%s1239_s1 + $0x38] sm:$0xf0] }
  0x14   :  { %121 = vperm.xlu1 %891, %v80_v16   ;;  %126 = vperm.xlu2 %892, %v81_v26   ;;  %v642_v10 = vld [vmem:[%s1241_s6 + $0x8] sm:$0x3]  ;;  %v471_v13 = vld [vmem:[%s1240_s4 + $0x20] sm:$0xff]  ;;  %v730_v25 = vld [vmem:[%s1239_s1 + $0x58] sm:$0xf0] }
  0x15   :  { %136 = vperm.xlu0 %890, %v83_v21   ;;  %v476_v11 = vld [vmem:[%s1240_s4 + $0x48] sm:$0xff]  ;;  %v720_v14 = vld [vmem:[%s1239_s1 + $0x40] sm:$0xf]  ;;  %v845_v16 = vld [vmem:[%s1239_s1 + $0x44] sm:$0xf] }
  0x16   :  { %342 = vmatpush.bf16.msra.mxu0 %v853_v17  ;;  %v641_v21 = vld [vmem:[%s1241_s6] sm:$0xff] }
  0x17   :  { %878 = vmatpush.bf16.msra.mxu3 %v853_v17  ;;  %390 = vmatpush.bf16.msra.mxu1 %v1006_v19  ;;  %v722_v17 = vld [vmem:[%s1239_s1 + $0x48] sm:$0xf0] }
  0x1a   :  { %343 = vmatpush.bf16.msra.mxu0 %v852_v20 }
  0x1b   :  { %879 = vmatpush.bf16.msra.mxu3 %v852_v20  ;;  %391 = vmatpush.bf16.msra.mxu1 %v860_v22  ;;  %v470_v20 = vld [vmem:[%s1240_s4 + $0x18] sm:$0xff] }
  0x1c   :  { %116 = vperm.xlu1 %891, %v79_v23   ;;  %101 = vperm.xlu2 %892, %v76_v38   ;;  %v848_v23 = vld [vmem:[%s1239_s1 + $0x54] sm:$0xf0] }
  0x1d   :  { %111 = vperm.xlu0 %890, %v78_v36  }
  0x1e   :  { %344 = vmatpush.bf16.msra.mxu0 %v851_v24 }
  0x1f   :  { %880 = vmatpush.bf16.msra.mxu3 %v851_v24  ;;  %392 = vmatpush.bf16.msra.mxu1 %v859_v30  ;;  %v847_v24 = vld [vmem:[%s1239_s1 + $0x54] sm:$0xf] }
  0x20   :  { %v733_v27 = vor.u32 %v847_v24, %v730_v25 }
  0x21   :  { %345 = vmatmul.bf16.vlgmr.msra.gmra.mxu0 %v689_v33 }
  0x22   :  { %375 = vmatmul.bf16.vlgmr.msra.gmra.mxu3 %v737_v34  ;;  %393 = vmatmul.bf16.vlgmr.msra.gmra.mxu1 %v693_v35 }
  0x23   :  { %881 = vmatpush.bf16.msrb.mxu3 %v940_v1  ;;  %v469_v1 = vld [vmem:[%s1240_s4 + $0x10] sm:$0xff] }
  0x24   :  { %91 = vperm.xlu1 %891, %v74_v37   ;;  %96 = vperm.xlu2 %892, %v75_v42  }
  0x25   :  { %106 = vperm.xlu0 %890, %v77_v40  }
  0x27   :  { %882 = vmatpush.bf16.msrb.mxu3 %v952_v5  ;;  %v843_v5 = vld [vmem:[%s1239_s1 + $0x34] sm:$0xf] }
  0x28   :  { %v717_v9 = vor.u32 %v843_v5, %v714_v6 }
  0x2b   :  { %883 = vmatpush.bf16.msrb.mxu3 %v961_v7  ;;  %v713_v7 = vor.u32 %v844_v4, %v712_v3 }
  0x2c   :  { %520 = vperm.xlu1 %891, %v475_v51   ;;  %525 = vperm.xlu2 %892, %v476_v11  }
  0x2d   :  { %530 = vperm.xlu0 %890, %v477_v50  }
  0x2f   :  { %884 = vmatpush.bf16.msrb.mxu3 %v979_v12  ;;  %v468_v12 = vld [vmem:[%s1240_s4 + $0x8] sm:$0xff] }
  0x31   :  { %350 = vmatmul.bf16.gmra.mxu0 %v697_v47 }
  0x32   :  { %380 = vmatmul.bf16.gmra.mxu3 %v223_v48  ;;  %398 = vmatmul.bf16.gmra.mxu1 %v701_v49 }
  0x33   :  { %885 = vmatpush.bf16.msrb.mxu3 %v991_v15  ;;  %v846_v15 = vld [vmem:[%s1239_s1 + $0x44] sm:$0xf0] }
  0x34   :  { %515 = vperm.xlu1 %891, %v474_v63   ;;  %500 = vperm.xlu2 %892, %v471_v13   ;;  %v721_v18 = vor.u32 %v846_v15, %v720_v14 }
  0x35   :  { %510 = vperm.xlu0 %890, %v473_v52  }
  0x37   :  { %886 = vmatpush.bf16.msrb.mxu3 %v1006_v19  ;;  %v725_v19 = vor.u32 %v845_v16, %v722_v17 }
  0x3b   :  { %887 = vmatpush.bf16.msrb.mxu3 %v860_v22  ;;  %v728_v22 = vld [vmem:[%s1239_s1 + $0x50] sm:$0xf] }
  0x3c   :  { %490 = vperm.xlu1 %891, %v469_v1   ;;  %495 = vperm.xlu2 %892, %v470_v20   ;;  %v729_v26 = vor.u32 %v848_v23, %v728_v22 }
  0x3d   :  { %505 = vperm.xlu0 %890, %v472_v62  }
  0x3f   :  { %888 = vmatpush.bf16.msrb.mxu3 %v859_v30 }
  0x41   :  { %355 = vmatmul.bf16.gmra.mxu0 %v705_v59 }
  0x42   :  { %423 = vmatmul.bf16.vlgmr.msrb.gmra.mxu3 %v741_v60  ;;  %403 = vmatmul.bf16.gmra.mxu1 %v709_v61 }
  0x44   :  { %485 = vperm.xlu1 %891, %v468_v12   ;;  %645 = vperm.xlu2 %892, %v641_v21  }
  0x45   :  { %480 = vperm.xlu0 %890, %v467_v0  }
  0x4d   :  { %650 = vperm.xlu0 %890, %v642_v10  }
  0x51   :  { %360 = vmatmul.bf16.gmra.mxu0 %v713_v7 }
  0x52   :  { %428 = vmatmul.bf16.gmra.mxu3 %v224_v8  ;;  %408 = vmatmul.bf16.gmra.mxu1 %v717_v9 }
  0x5e   :  { %v1177_v29 = vpop.permute.xlu2 %146 }
  0x61   :  { %365 = vmatmul.bf16.gmra.mxu0 %v721_v18 }
  0x62   :  { %413 = vmatmul.bf16.gmra.mxu1 %v725_v19 }
  0x66   :  { %v1181_v31 = vpop.permute.xlu2 %131 }
  0x6e   :  { %v1185_v34 = vpop.permute.xlu2 %126 }
  0x71   :  { %370 = vmatmul.bf16.gmra.mxu0 %v729_v26 }
  0x72   :  { %418 = vmatmul.bf16.gmra.mxu1 %v733_v27 }
  0x76   :  { %v157_v28 = vpop.permute.xlu1 %156  ;;  %v102_v37 = vpop.permute.xlu2 %101 }
  0x77   :  { %v162_v33 = vpop.permute.xlu0 %161 }
  0x7e   :  { %v1179_v30 = vpop.permute.xlu1 %141  ;;  %v97_v45 = vpop.permute.xlu2 %96 }
  0x7f   :  { %v152_v36 = vpop.permute.xlu0 %151 }
  0x86   :  { %v1183_v32 = vpop.permute.xlu1 %121 }
  0x87   :  { %v1189_v42 = vpop.permute.xlu0 %136 }
  0x8e   :  { %v1187_v35 = vpop.permute.xlu1 %116 }
  0x8f   :  { %v112_v50 = vpop.permute.xlu0 %111 }
  0x96   :  { %v92_v38 = vpop.permute.xlu1 %91 }
  0x97   :  { %v107_v60 = vpop.permute.xlu0 %106 }
  0x9e   :  { %v346_v39 = vpop.f32.mrf.mxu0 }
  0x9f   :  { %v347_v40 = vadd.f32 %v346_v39, %v92_v38  ;;  %v394_v41 = vpop.f32.mrf.mxu1 }
  0xa1   :  { %v395_v43 = vadd.f32 %v394_v41, %v347_v40 }
  0xa3   :  { %v433_v51 = vmax.f32 %v395_v43, 0.0 }
  0xa5   :  { %v376_v44 = vpop.f32.mrf.mxu3 }
  0xa6   :  { %v348_v46 = vpop.f32.mrf.mxu0  ;;  %v377_v19 = vadd.f32 %v376_v44, %v152_v36 }
  0xa7   :  { %v349_v47 = vadd.f32 %v348_v46, %v97_v45  ;;  %v396_v48 = vpop.f32.mrf.mxu1 }
  0xa9   :  { %v397_v49 = vadd.f32 %v396_v48, %v349_v47 }
  0xab   :  { %v434_v52 = vmax.f32 %v397_v49, 0.0 }
  0xad   :  { %v378_v53 = vpop.f32.mrf.mxu3  ;;  %v1191_v54 = vpack.c.bf16 %v434_v52, %v433_v51 }
  0xae   :  { %v351_v55 = vpop.f32.mrf.mxu0  ;;  %v379_v16 = vadd.f32 %v378_v53, %v157_v28 }
  0xaf   :  { %v352_v56 = vadd.f32 %v351_v55, %v102_v37  ;;  %v399_v57 = vpop.f32.mrf.mxu1 }
  0xb1   :  { %v400_v58 = vadd.f32 %v399_v57, %v352_v56 }
  0xb3   :  { %v435_v1 = vmax.f32 %v400_v58, 0.0 }
  0xb5   :  { %v381_v59 = vpop.f32.mrf.mxu3 }
  0xb6   :  { %v353_v61 = vpop.f32.mrf.mxu0  ;;  %v382_v15 = vadd.f32 %v381_v59, %v162_v33 }
  0xb7   :  { %v354_v62 = vadd.f32 %v353_v61, %v107_v60  ;;  %v401_v63 = vpop.f32.mrf.mxu1 }
  0xb9   :  { %v402_v0 = vadd.f32 %v401_v63, %v354_v62 }
  0xbb   :  { %v436_v2 = vmax.f32 %v402_v0, 0.0 }
  0xbd   :  { %v383_v3 = vpop.f32.mrf.mxu3  ;;  %v1193_v4 = vpack.c.bf16 %v436_v2, %v435_v1 }
  0xbe   :  { %v356_v5 = vpop.f32.mrf.mxu0  ;;  %v868_v3 = vld [vmem:[%s1242_s3 + $0x8] sm:$0xff] }
  0xbf   :  { %v357_v6 = vadd.f32 %v356_v5, %v112_v50  ;;  %v404_v7 = vpop.f32.mrf.mxu1  ;;  %v869_v5 = vld [vmem:[%s1242_s3 + $0x10] sm:$0xff] }
  0xc1   :  { %v1195_v8 = vadd.f32 %v404_v7, %v357_v6  ;;  %v466_v6 = vld [vmem:[%s1242_s3 + $0x28] sm:$0x3] }
  0xc2   :  { %v554_v7 = vunpack.c.l.b16 %v466_v6 }
  0xc5   :  { %v424_v9 = vpop.f32.mrf.mxu3 }
  0xc6   :  { %v358_v10 = vpop.f32.mrf.mxu0  ;;  %v425_v24 = vadd.f32 %v424_v9, %v377_v19  ;;  %v531_v9 = vpop.permute.xlu0 %530 }
  0xc7   :  { %v406_v11 = vpop.f32.mrf.mxu1 }
  0xc8   :  { %v445_v37 = vmax.f32 %v425_v24, 0.0 }
  0xcd   :  { %v426_v12 = vpop.f32.mrf.mxu3 }
  0xce   :  { %v361_v13 = vpop.f32.mrf.mxu0  ;;  %v427_v20 = vadd.f32 %v426_v12, %v379_v16  ;;  %v526_v16 = vpop.permute.xlu2 %525 }
  0xcf   :  { %v409_v14 = vpop.f32.mrf.mxu1  ;;  %v362_v55 = vadd.f32 %v361_v13, %v1183_v32  ;;  %v437_v32 = vmax.f32 %v1195_v8, 0.0  ;;  %v560_v8 = vpack.c.b16 %v554_v7, %v554_v7 }
  0xd0   :  { %v446_v26 = vmax.f32 %v427_v20, 0.0 }
  0xd1   :  { %v410_v61 = vadd.f32 %v409_v14, %v362_v55 }
  0xd2   :  { %v454_v40 = vpack.c.bf16 %v446_v26, %v445_v37 }
  0xd3   :  { %v439_v0 = vmax.f32 %v410_v61, 0.0 }
  0xd5   :  { %v429_v17 = vpop.f32.mrf.mxu3 }
  0xd6   :  { %v430_v18 = vadd.f32 %v429_v17, %v382_v15  ;;  %v363_v21 = vpop.f32.mrf.mxu0 }
  0xd7   :  { %v411_v23 = vpop.f32.mrf.mxu1  ;;  %v364_v51 = vadd.f32 %v363_v21, %v1185_v34 }
  0xd8   :  { %v447_v22 = vmax.f32 %v430_v18, 0.0 }
  0xd9   :  { %v412_v59 = vadd.f32 %v411_v23, %v364_v51 }
  0xda   :  { %v455_v25 = vpack.c.bf16 %v447_v22, %v447_v22 }
  0xdc   :  { %v582_v27 = vsel %vm580_vm0, %v455_v25, 0  ;;  %v501_v25 = vpop.permute.xlu2 %500 }
  0xdd   :  { %584 = vmatpush.bf16.msra.mxu2 %v582_v27  ;;  %v431_v38 = vpop.f32.mrf.mxu3 }
  0xde   :  { %v366_v39 = vpop.f32.mrf.mxu0 }
  0xdf   :  { %v414_v41 = vpop.f32.mrf.mxu1  ;;  %v367_v47 = vadd.f32 %v366_v39, %v1181_v31 }
  0xe1   :  { %585 = vmatpush.bf16.msra.mxu2 %v454_v40  ;;  %v415_v56 = vadd.f32 %v414_v41, %v367_v47 }
  0xe3   :  { %v441_v31 = vmax.f32 %v415_v56, 0.0 }
  0xe4   :  { %v496_v37 = vpop.permute.xlu2 %495 }
  0xe6   :  { %v368_v28 = vpop.f32.mrf.mxu0 }
  0xe7   :  { %v416_v33 = vpop.f32.mrf.mxu1  ;;  %v369_v45 = vadd.f32 %v368_v28, %v1189_v42 }
  0xe9   :  { %v417_v52 = vadd.f32 %v416_v33, %v369_v45 }
  0xeb   :  { %v442_v42 = vmax.f32 %v417_v52, 0.0 }
  0xed   :  { %v452_v63 = vpack.c.bf16 %v442_v42, %v441_v31 }
  0xee   :  { %v371_v43 = vpop.f32.mrf.mxu0 }
  0xef   :  { %v419_v36 = vpop.f32.mrf.mxu1  ;;  %v372_v44 = vadd.f32 %v371_v43, %v1179_v30  ;;  %v359_v30 = vadd.f32 %v358_v10, %v1187_v35  ;;  %v867_v35 = vld [vmem:[%s1242_s3] sm:$0xff]  ;;  %v521_v10 = vpop.permute.xlu1 %520 }
  0xf1   :  { %v420_v48 = vadd.f32 %v419_v36, %v372_v44  ;;  %v407_v62 = vadd.f32 %v406_v11, %v359_v30  ;;  %v511_v11 = vpop.permute.xlu0 %510 }
  0xf3   :  { %v443_v57 = vmax.f32 %v420_v48, 0.0  ;;  %v438_v34 = vmax.f32 %v407_v62, 0.0 }
  0xf5   :  { %v450_v2 = vpack.c.bf16 %v438_v34, %v437_v32  ;;  %v834_v34 = vld [vmem:[%s1243_s5] sm:$0xf] }
  0xf6   :  { %v373_v46 = vpop.f32.mrf.mxu0 }
  0xf7   :  { %v374_v49 = vadd.f32 %v373_v46, %v1177_v29  ;;  %v421_v50 = vpop.f32.mrf.mxu1  ;;  %v440_v29 = vmax.f32 %v412_v59, 0.0  ;;  %v516_v12 = vpop.permute.xlu1 %515 }
  0xf9   :  { %v422_v53 = vadd.f32 %v421_v50, %v374_v49  ;;  %v451_v1 = vpack.c.bf16 %v440_v29, %v439_v0  ;;  %v506_v13 = vpop.permute.xlu0 %505 }
  0xfb   :  { %v444_v58 = vmax.f32 %v422_v53, 0.0 }
  0xfd   :  { %v453_v60 = vpack.c.bf16 %v444_v58, %v443_v57 }
  0xff   :  { %586 = vmatpush.bf16.msra.mxu2 %v453_v60  ;;  %v491_v14 = vpop.permute.xlu1 %490 }
 0x101   :  { %v481_v17 = vpop.permute.xlu0 %480 }
 0x103   :  { %587 = vmatpush.bf16.msra.mxu2 %v452_v63 }
 0x107   :  { %588 = vmatpush.bf16.msra.mxu2 %v451_v1  ;;  %v486_v19 = vpop.permute.xlu1 %485  ;;  %v872_v1 = vld [vmem:[%s1243_s5] sm:$0x10] }
 0x108   :  { %v835_v32 = vor.u32 %v872_v1, %v834_v34 }
 0x10b   :  { %589 = vmatpush.bf16.msra.mxu2 %v450_v2  ;;  %v646_v2 = vpop.permute.xlu2 %645 }
 0x10f   :  { %590 = vmatpush.bf16.msra.mxu2 %v1193_v4  ;;  %v870_v4 = vld [vmem:[%s1242_s3 + $0x18] sm:$0xff] }
 0x113   :  { %591 = vmatpush.bf16.msra.mxu2 %v1191_v54  ;;  %v871_v54 = vld [vmem:[%s1242_s3 + $0x20] sm:$0xff] }
 0x116   :  { %826 = vmatmul.msk.bf16.vlgmr.msra.gmra.mxu2 %vm561_vm1, %v867_v35 }
 0x126   :  { %827 = vmatmul.msk.bf16.gmra.mxu2 %vm561_vm1, %v868_v3 }
 0x136   :  { %828 = vmatmul.msk.bf16.gmra.mxu2 %vm561_vm1, %v869_v5  ;;  %v651_v5 = vpop.permute.xlu0 %650 }
 0x146   :  { %829 = vmatmul.msk.bf16.gmra.mxu2 %vm561_vm1, %v870_v4 }
 0x156   :  { %830 = vmatmul.msk.bf16.gmra.mxu2 %vm561_vm1, %v871_v54 }
 0x166   :  { %831 = vmatmul.msk.bf16.gmra.mxu2 %vm561_vm1, %v560_v8 }
 0x199   :  { %v593_v15 = vpop.f32.mrf.mxu2 }
 0x19a   :  { %v594_v18 = vadd.f32 %v593_v15, %v481_v17 }
 0x19c   :  { %v622_v22 = vmax.f32 %v594_v18, 0.0 }
 0x1a1   :  { %v595_v20 = vpop.f32.mrf.mxu2 }
 0x1a2   :  { %v596_v21 = vadd.f32 %v595_v20, %v486_v19 }
 0x1a4   :  { %v623_v23 = vmax.f32 %v596_v21, 0.0 }
 0x1a6   :  { %v633_v24 = vpack.c.bf16 %v623_v23, %v622_v22 }
 0x1a9   :  { %v598_v26 = vpop.f32.mrf.mxu2 }
 0x1aa   :  { %v599_v27 = vadd.f32 %v598_v26, %v491_v14 }
 0x1ac   :  { %v624_v40 = vmax.f32 %v599_v27, 0.0 }
 0x1b1   :  { %v600_v38 = vpop.f32.mrf.mxu2 }
 0x1b2   :  { %v601_v39 = vadd.f32 %v600_v38, %v496_v37 }
 0x1b4   :  { %v625_v41 = vmax.f32 %v601_v39, 0.0 }
 0x1b6   :  { %v634_v28 = vpack.c.bf16 %v625_v41, %v624_v40 }
 0x1b9   :  { %v603_v33 = vpop.f32.mrf.mxu2 }
 0x1ba   :  { %v604_v61 = vadd.f32 %v603_v33, %v501_v25 }
 0x1bc   :  { %v626_v63 = vmax.f32 %v604_v61, 0.0 }
 0x1c1   :  { %v605_v43 = vpop.f32.mrf.mxu2 }
 0x1c2   :  { %v606_v59 = vadd.f32 %v605_v43, %v506_v13 }
 0x1c4   :  { %v627_v62 = vmax.f32 %v606_v59, 0.0 }
 0x1c6   :  { %v635_v0 = vpack.c.bf16 %v627_v62, %v626_v63 }
 0x1c9   :  { %v608_v36 = vpop.f32.mrf.mxu2 }
 0x1ca   :  { %v609_v57 = vadd.f32 %v608_v36, %v511_v11 }
 0x1cc   :  { %v628_v31 = vmax.f32 %v609_v57, 0.0 }
 0x1d1   :  { %v610_v44 = vpop.f32.mrf.mxu2 }
 0x1d2   :  { %v611_v53 = vadd.f32 %v610_v44, %v516_v12 }
 0x1d4   :  { %v629_v42 = vmax.f32 %v611_v53, 0.0 }
 0x1d6   :  { %v636_v29 = vpack.c.bf16 %v629_v42, %v628_v31 }
 0x1d9   :  { %v613_v45 = vpop.f32.mrf.mxu2 }
 0x1da   :  { %v614_v51 = vadd.f32 %v613_v45, %v521_v10 }
 0x1dc   :  { %v630_v58 = vmax.f32 %v614_v51, 0.0 }
 0x1e1   :  { %v615_v46 = vpop.f32.mrf.mxu2 }
 0x1e2   :  { %v616_v49 = vadd.f32 %v615_v46, %v526_v16 }
 0x1e4   :  { %v631_v55 = vmax.f32 %v616_v49, 0.0 }
 0x1e6   :  { %v637_v60 = vpack.c.bf16 %v631_v55, %v630_v58 }
 0x1e9   :  { %v618_v47 = vpop.f32.mrf.mxu2 }
 0x1ea   :  { %v619_v48 = vadd.f32 %v618_v47, %v531_v9 }
 0x1ec   :  { %v632_v50 = vmax.f32 %v619_v48, 0.0 }
 0x1ee   :  { %v638_v52 = vpack.c.bf16 %v632_v50, %v632_v50 }
 0x1f0   :  { %v664_v56 = vsel %vm662_vm2, %v638_v52, 0 }
 0x1f1   :  { %v620_v30 = vpop.f32.mrf.mxu2  ;;  %668 = vmatpush.bf16.msra.mxu3 %v664_v56 }
 0x1f5   :  { %669 = vmatpush.bf16.msra.mxu3 %v637_v60 }
 0x1f9   :  { %670 = vmatpush.bf16.msra.mxu3 %v636_v29 }
 0x1fd   :  { %671 = vmatpush.bf16.msra.mxu3 %v635_v0 }
 0x201   :  { %672 = vmatpush.bf16.msra.mxu3 %v634_v28 }
 0x205   :  { %673 = vmatpush.bf16.msra.mxu3 %v633_v24 }
 0x208   :  { %836 = vmatmul.msk.bf16.vlgmr.msra.gmra.mxu3 %vm658_vm3, %v835_v32 }
 0x28b   :  { %v675_v35 = vpop.f32.mrf.mxu3 }
 0x28c   :  { %v676_v3 = vadd.f32 %v675_v35, %v646_v2 }
 0x28e   :  { %680 = vst [vmem:[%s1244_s7] sm:$0xff] %v676_v3 }
 0x293   :  { %v677_v4 = vpop.f32.mrf.mxu3 }
 0x294   :  { %v678_v54 = vadd.f32 %v677_v4, %v651_v5 }
 0x296   :  { %681 = vst [vmem:[%s1244_s7 + $0x8] sm:$0x3] %v678_v54 }

</bundles_post_ra>
